<compile_context>
chip_gen: v6e
topology: v6e:2x2x1
jax: 0.10.0
libtpu: 0.0.40
codegen_flags: <defaults>
</compile_context>

<pallas_src>
import math
import functools

import jax
import jax.numpy as jnp
from jax import lax
from jax.experimental import pallas as pl
from jax.experimental.pallas import tpu as pltpu


LN_EPS = 1e-6  # layer_norm_eps


# ---------------------------------------------------------------------------
# Kernel
# ---------------------------------------------------------------------------

def _layer_norm(h, g, b, eps):
    m = jnp.mean(h, axis=-1, keepdims=True)
    v = jnp.mean((h - m) ** 2, axis=-1, keepdims=True)
    return (h - m) * lax.rsqrt(v + eps) * g + b


def fused_encoder_kernel(
        # scalar-prefetch
        xlens_ref,
        # inputs
        x_ref,
        emb_w_ref, emb_b_ref, ln_in_g_ref, ln_in_b_ref,
        ln1_g_ref, ln1_b_ref,
        wq_ref, bq_ref, wk_ref, bk_ref, wv_ref, bv_ref,
        wo_ref, bo_ref,
        ln2_g_ref, ln2_b_ref,
        w1_ref, b1_ref, w2_ref, b2_ref,
        ln_top_g_ref, ln_top_b_ref,
        # output
        o_ref,
        # scratch
        act_ref,
        *, nheads, d_model, eps):
    b = pl.program_id(0)
    l = pl.program_id(1)
    nlayers = pl.num_programs(1)

    T = x_ref.shape[1]
    dk = d_model // nheads
    inv_sqrt_dk = 1.0 / math.sqrt(dk)

    # ---- embed_in(xs) * sqrt(d_model), then layer_norm_in (layer step 0 only)
    @pl.when(l == 0)
    def _embed():
        x_in = x_ref[0].astype(jnp.bfloat16)                          # (T, Fin)
        h0 = jnp.dot(x_in, emb_w_ref[...],
                     preferred_element_type=jnp.float32) + emb_b_ref[...]
        h0 = h0 * math.sqrt(d_model)
        act_ref[...] = _layer_norm(h0, ln_in_g_ref[...], ln_in_b_ref[...], eps)

    # ---- padding mask rebuilt in-kernel from xlens (matches reference xx_mask:
    #      only the [xlen:, xlen:] square is masked with -1024)
    xlen = xlens_ref[b]
    row = lax.broadcasted_iota(jnp.int32, (T, T), 0)
    col = lax.broadcasted_iota(jnp.int32, (T, T), 1)
    pad_sq = jnp.logical_and(row >= xlen, col >= xlen)                # (T, T) bool

    x = act_ref[...]                                                  # (T, D) f32

    # ---- self-attention sublayer: x + MHA(LN1(x)); heads on leading batch axis
    h = _layer_norm(x, ln1_g_ref[0], ln1_b_ref[0], eps)
    hb = jnp.broadcast_to(h.astype(jnp.bfloat16)[None],
                          (nheads, T, d_model))                       # (H, T, D)
    q = jnp.einsum('htd,hdk->htk', hb, wq_ref[0],
                   preferred_element_type=jnp.float32) + bq_ref[0]    # (H, T, dk)
    k = jnp.einsum('htd,hdk->htk', hb, wk_ref[0],
                   preferred_element_type=jnp.float32) + bk_ref[0]
    v = jnp.einsum('htd,hdk->htk', hb, wv_ref[0],
                   preferred_element_type=jnp.float32) + bv_ref[0]

    s = jnp.einsum('hqd,hkd->hqk',
                   q.astype(jnp.bfloat16), k.astype(jnp.bfloat16),
                   preferred_element_type=jnp.float32) * inv_sqrt_dk  # (H, T, T)
    s = jnp.where(pad_sq[None], -1024.0, s)                           # pad fill (ref)
    s = s - jnp.max(s, axis=-1, keepdims=True)
    e = jnp.exp(s)
    p = e * pl.reciprocal(jnp.sum(e, axis=-1, keepdims=True), approx=True)

    ctx = jnp.einsum('hqk,hkd->hqd',
                     p.astype(jnp.bfloat16), v.astype(jnp.bfloat16),
                     preferred_element_type=jnp.float32)              # (H, T, dk)
    ctx_o = jnp.einsum('hqd,hdm->hqm',
                       ctx.astype(jnp.bfloat16), wo_ref[0],
                       preferred_element_type=jnp.float32)            # (H, T, D)
    attn_out = jnp.sum(ctx_o, axis=0) + bo_ref[0]                     # (T, D)
    x = x + attn_out

    # ---- feed-forward sublayer: x + FFN(LN2(x))
    h2 = _layer_norm(x, ln2_g_ref[0], ln2_b_ref[0], eps)
    ff = jnp.dot(h2.astype(jnp.bfloat16), w1_ref[0],
                 preferred_element_type=jnp.float32) + b1_ref[0]
    ff = jnp.maximum(ff, 0.0)                                         # ReLU
    ff = jnp.dot(ff.astype(jnp.bfloat16), w2_ref[0],
                 preferred_element_type=jnp.float32) + b2_ref[0]
    x = x + ff

    act_ref[...] = x                                                  # carry to next layer

    # ---- layer_norm_top, written once per batch element at the last layer step
    @pl.when(l == nlayers - 1)
    def _final():
        o_ref[0] = _layer_norm(x, ln_top_g_ref[...], ln_top_b_ref[...], eps)


# ---------------------------------------------------------------------------
# Wrapper (parameter packing + pallas_call)
# ---------------------------------------------------------------------------

def transformer_encoder_forward(xs, xlens, params, nheads, d_model, eps=LN_EPS):
    B, T, Fin = xs.shape
    D = d_model
    dk = D // nheads
    layers = params["layers"]
    L = len(layers)
    bf16 = jnp.bfloat16

    # --- host-side packing: stack per-layer weights along [L], split heads,
    #     cast matmul weights to bf16 (biases / LN params stay f32).
    def split_in(w):       # (D, D) -> (H, D, dk): per-head output columns
        return jnp.transpose(w.reshape(D, nheads, dk), (1, 0, 2))

    def split_out(w):      # (D, D) -> (H, dk, D): per-head input rows
        return w.reshape(nheads, dk, D)

    def split_bias(brow):  # (1, D) -> (H, 1, dk)
        return brow.reshape(nheads, dk)[:, None, :]

    wq = jnp.stack([split_in(lp["wq"]) for lp in layers]).astype(bf16)
    wk = jnp.stack([split_in(lp["wk"]) for lp in layers]).astype(bf16)
    wv = jnp.stack([split_in(lp["wv"]) for lp in layers]).astype(bf16)
    wo = jnp.stack([split_out(lp["wo"]) for lp in layers]).astype(bf16)
    bq = jnp.stack([split_bias(lp["bq"]) for lp in layers])
    bk = jnp.stack([split_bias(lp["bk"]) for lp in layers])
    bv = jnp.stack([split_bias(lp["bv"]) for lp in layers])
    bo = jnp.stack([lp["bo"] for lp in layers])
    ln1_g = jnp.stack([lp["ln1_g"] for lp in layers])
    ln1_b = jnp.stack([lp["ln1_b"] for lp in layers])
    ln2_g = jnp.stack([lp["ln2_g"] for lp in layers])
    ln2_b = jnp.stack([lp["ln2_b"] for lp in layers])
    w1 = jnp.stack([lp["w1"] for lp in layers]).astype(bf16)
    b1 = jnp.stack([lp["b1"] for lp in layers])
    w2 = jnp.stack([lp["w2"] for lp in layers]).astype(bf16)
    b2 = jnp.stack([lp["b2"] for lp in layers])

    emb_w = params["emb_w"].astype(bf16)
    emb_b = params["emb_b"]
    ln_in_g, ln_in_b = params["ln_in_g"], params["ln_in_b"]
    ln_top_g, ln_top_b = params["ln_top_g"], params["ln_top_b"]

    # --- BlockSpecs (index_maps receive (b, l, xlens_ref) with scalar prefetch)
    def rep(arr):
        nd = arr.ndim
        return pl.BlockSpec(arr.shape, lambda bb, ll, xl, _n=nd: (0,) * _n)

    def per_layer(arr):
        nd = arr.ndim - 1
        return pl.BlockSpec((1,) + arr.shape[1:],
                            lambda bb, ll, xl, _n=nd: (ll,) + (0,) * _n)

    global_arrays = (emb_w, emb_b, ln_in_g, ln_in_b)
    layer_arrays = (ln1_g, ln1_b, wq, bq, wk, bk, wv, bv, wo, bo,
                    ln2_g, ln2_b, w1, b1, w2, b2)
    top_arrays = (ln_top_g, ln_top_b)

    in_specs = [pl.BlockSpec((1, T, Fin), lambda bb, ll, xl: (bb, 0, 0))]
    in_specs += [rep(a) for a in global_arrays]
    in_specs += [per_layer(a) for a in layer_arrays]
    in_specs += [rep(a) for a in top_arrays]

    kernel = functools.partial(fused_encoder_kernel,
                               nheads=nheads, d_model=d_model, eps=eps)

    xs_out = pl.pallas_call(
        kernel,
        out_shape=jax.ShapeDtypeStruct((B, T, D), jnp.float32),
        grid_spec=pltpu.PrefetchScalarGridSpec(
            num_scalar_prefetch=1,
            grid=(B, L),
            in_specs=in_specs,
            out_specs=pl.BlockSpec((1, T, D), lambda bb, ll, xl: (bb, 0, 0)),
            scratch_shapes=[pltpu.VMEM((T, D), jnp.float32)]),
        compiler_params=pltpu.CompilerParams(
            dimension_semantics=("parallel", "arbitrary")),
    )(xlens.astype(jnp.int32), xs,
      *global_arrays, *layer_arrays, *top_arrays)

    eouts = {k: {"xs": None, "xlens": None}
             for k in ["ys", "ys.ctc", "ys_sub1", "ys_sub1.ctc",
                       "ys_sub2", "ys_sub2.ctc"]}
    eouts["ys"]["xs"] = xs_out
    eouts["ys"]["xlens"] = xlens
    return eouts


# ---------------------------------------------------------------------------
# Parameter init (deterministic, synthetic)
# ---------------------------------------------------------------------------

def init_params(key, input_dim, d_model, d_ff, nlayers):
    def lin(key, fan_in, fan_out):
        return (jax.random.normal(key, (fan_in, fan_out), jnp.float32) * 0.05,
                jnp.zeros((1, fan_out), jnp.float32))

    keys = jax.random.split(key, 1 + nlayers * 6)
    emb_w, emb_b = lin(keys[0], input_dim, d_model)
    params = {
        "emb_w": emb_w, "emb_b": emb_b,
        "ln_in_g": jnp.ones((1, d_model), jnp.float32),
        "ln_in_b": jnp.zeros((1, d_model), jnp.float32),
        "ln_top_g": jnp.ones((1, d_model), jnp.float32),
        "ln_top_b": jnp.zeros((1, d_model), jnp.float32),
        "layers": [],
    }
    for l in range(nlayers):
        k = keys[1 + l * 6: 1 + (l + 1) * 6]
        wq, bq = lin(k[0], d_model, d_model)
        wk, bk = lin(k[1], d_model, d_model)
        wv, bv = lin(k[2], d_model, d_model)
        wo, bo = lin(k[3], d_model, d_model)
        w1, b1 = lin(k[4], d_model, d_ff)
        w2, b2 = lin(k[5], d_ff, d_model)
        params["layers"].append({
            "ln1_g": jnp.ones((1, d_model), jnp.float32),
            "ln1_b": jnp.zeros((1, d_model), jnp.float32),
            "wq": wq, "bq": bq, "wk": wk, "bk": bk, "wv": wv, "bv": bv,
            "wo": wo, "bo": bo,
            "ln2_g": jnp.ones((1, d_model), jnp.float32),
            "ln2_b": jnp.zeros((1, d_model), jnp.float32),
            "w1": w1, "b1": b1, "w2": w2, "b2": b2,
        })
    return params


# ---------------------------------------------------------------------------
# TODO(synk): CNNEncoder front-end (conv_poolings) and PositionalEncoding
# (pe_type) are not instantiated in this configuration; dropout is eval-mode.
# ---------------------------------------------------------------------------

if __name__ == "__main__":
    B, T = 2, 8
    input_dim = 16
    d_model, d_ff, nheads, nlayers = 32, 64, 4, 2

    key = jax.random.PRNGKey(0)
    k_x, k_p = jax.random.split(key)
    xs = jax.random.normal(k_x, (B, T, input_dim), jnp.float32)
    xlens = jnp.array([T, T - 2], dtype=jnp.int32)
    params = init_params(k_p, input_dim, d_model, d_ff, nlayers)

    eouts = transformer_encoder_forward(xs, xlens, params, nheads, d_model)
    out = jax.block_until_ready(eouts["ys"]["xs"])
    assert out.shape == (B, T, d_model)
    print("KERNEL_OK")
</pallas_src>

<mosaic_0001>
module attributes {stable_mosaic.version = 11 : i64} {
  func.func @fused_encoder_kernel(%arg0: i32, %arg1: i32, %arg2: memref<2xi32, #tpu.memory_space<smem>>, %arg3: memref<1x8x16xf32, #tpu.memory_space<vmem>>, %arg4: memref<16x32xbf16, #tpu.memory_space<vmem>>, %arg5: memref<1x32xf32, #tpu.memory_space<vmem>>, %arg6: memref<1x32xf32, #tpu.memory_space<vmem>>, %arg7: memref<1x32xf32, #tpu.memory_space<vmem>>, %arg8: memref<1x1x32xf32, #tpu.memory_space<vmem>>, %arg9: memref<1x1x32xf32, #tpu.memory_space<vmem>>, %arg10: memref<1x4x32x8xbf16, #tpu.memory_space<vmem>>, %arg11: memref<1x4x1x8xf32, #tpu.memory_space<vmem>>, %arg12: memref<1x4x32x8xbf16, #tpu.memory_space<vmem>>, %arg13: memref<1x4x1x8xf32, #tpu.memory_space<vmem>>, %arg14: memref<1x4x32x8xbf16, #tpu.memory_space<vmem>>, %arg15: memref<1x4x1x8xf32, #tpu.memory_space<vmem>>, %arg16: memref<1x4x8x32xbf16, #tpu.memory_space<vmem>>, %arg17: memref<1x1x32xf32, #tpu.memory_space<vmem>>, %arg18: memref<1x1x32xf32, #tpu.memory_space<vmem>>, %arg19: memref<1x1x32xf32, #tpu.memory_space<vmem>>, %arg20: memref<1x32x64xbf16, #tpu.memory_space<vmem>>, %arg21: memref<1x1x64xf32, #tpu.memory_space<vmem>>, %arg22: memref<1x64x32xbf16, #tpu.memory_space<vmem>>, %arg23: memref<1x1x32xf32, #tpu.memory_space<vmem>>, %arg24: memref<1x32xf32, #tpu.memory_space<vmem>>, %arg25: memref<1x32xf32, #tpu.memory_space<vmem>>, %arg26: memref<1x8x32xf32, #tpu.memory_space<vmem>>, %arg27: memref<8x32xf32, #tpu.memory_space<vmem>>) attributes {dimension_semantics = [#tpu.dimension_semantics<parallel>, #tpu.dimension_semantics<arbitrary>], iteration_bounds = array<i64: 2, 2>, scalar_prefetch = 1 : i64, scratch_operands = 1 : i64, tpu.core_type = #tpu.core_type<tc>, window_params = [{transform_indices = @transform_0, window_bounds = array<i64: 1, 8, 16>}, {pipeline_mode = #tpu.pipeline_mode<synchronous>, transform_indices = @transform_1, window_bounds = array<i64: 16, 32>}, {pipeline_mode = #tpu.pipeline_mode<synchronous>, transform_indices = @transform_2, window_bounds = array<i64: 1, 32>}, {pipeline_mode = #tpu.pipeline_mode<synchronous>, transform_indices = @transform_3, window_bounds = array<i64: 1, 32>}, {pipeline_mode = #tpu.pipeline_mode<synchronous>, transform_indices = @transform_4, window_bounds = array<i64: 1, 32>}, {transform_indices = @transform_5, window_bounds = array<i64: 1, 1, 32>}, {transform_indices = @transform_6, window_bounds = array<i64: 1, 1, 32>}, {transform_indices = @transform_7, window_bounds = array<i64: 1, 4, 32, 8>}, {transform_indices = @transform_8, window_bounds = array<i64: 1, 4, 1, 8>}, {transform_indices = @transform_9, window_bounds = array<i64: 1, 4, 32, 8>}, {transform_indices = @transform_10, window_bounds = array<i64: 1, 4, 1, 8>}, {transform_indices = @transform_11, window_bounds = array<i64: 1, 4, 32, 8>}, {transform_indices = @transform_12, window_bounds = array<i64: 1, 4, 1, 8>}, {transform_indices = @transform_13, window_bounds = array<i64: 1, 4, 8, 32>}, {transform_indices = @transform_14, window_bounds = array<i64: 1, 1, 32>}, {transform_indices = @transform_15, window_bounds = array<i64: 1, 1, 32>}, {transform_indices = @transform_16, window_bounds = array<i64: 1, 1, 32>}, {transform_indices = @transform_17, window_bounds = array<i64: 1, 32, 64>}, {transform_indices = @transform_18, window_bounds = array<i64: 1, 1, 64>}, {transform_indices = @transform_19, window_bounds = array<i64: 1, 64, 32>}, {transform_indices = @transform_20, window_bounds = array<i64: 1, 1, 32>}, {pipeline_mode = #tpu.pipeline_mode<synchronous>, transform_indices = @transform_21, window_bounds = array<i64: 1, 32>}, {pipeline_mode = #tpu.pipeline_mode<synchronous>, transform_indices = @transform_22, window_bounds = array<i64: 1, 32>}, {transform_indices = @transform_23, window_bounds = array<i64: 1, 8, 32>}]} {
    %c0_i32 = arith.constant 0 : i32
    %0 = arith.cmpi eq, %arg1, %c0_i32 : i32
    %1 = arith.extui %0 : i1 to i32
    %c0_i32_0 = arith.constant 0 : i32
    %2 = arith.cmpi ne, %1, %c0_i32_0 : i32
    scf.if %2 {
      %c0_83 = arith.constant 0 : index
      %c0_84 = arith.constant 0 : index
      %c0_85 = arith.constant 0 : index
      %146 = vector.load %arg3[%c0_83, %c0_84, %c0_85] : memref<1x8x16xf32, #tpu.memory_space<vmem>>, vector<1x8x16xf32>
      %147 = vector.shape_cast %146 : vector<1x8x16xf32> to vector<8x16xf32>
      %148 = arith.truncf %147 : vector<8x16xf32> to vector<8x16xbf16>
      %c0_86 = arith.constant 0 : index
      %c0_87 = arith.constant 0 : index
      %149 = vector.load %arg4[%c0_86, %c0_87] : memref<16x32xbf16, #tpu.memory_space<vmem>>, vector<16x32xbf16>
      %cst_88 = arith.constant dense<0.000000e+00> : vector<8x32xf32>
      %150 = tpu.matmul %148, %149, %cst_88 {dimension_numbers = #tpu.dot_dimension_numbers<[1], [0], [0], [1], [0, 0, 1, 1], [], []>} : vector<8x16xbf16>, vector<16x32xbf16>, vector<8x32xf32> -> vector<8x32xf32>
      %c0_89 = arith.constant 0 : index
      %c0_90 = arith.constant 0 : index
      %151 = vector.load %arg5[%c0_89, %c0_90] : memref<1x32xf32, #tpu.memory_space<vmem>>, vector<1x32xf32>
      %152 = vector.broadcast %151 : vector<1x32xf32> to vector<8x32xf32>
      %153 = arith.addf %150, %152 : vector<8x32xf32>
      %cst_91 = arith.constant 5.65685415 : f32
      %154 = vector.broadcast %cst_91 : f32 to vector<8x32xf32>
      %155 = arith.mulf %153, %154 : vector<8x32xf32>
      %c0_92 = arith.constant 0 : index
      %c0_93 = arith.constant 0 : index
      %156 = vector.load %arg6[%c0_92, %c0_93] : memref<1x32xf32, #tpu.memory_space<vmem>>, vector<1x32xf32>
      %c0_94 = arith.constant 0 : index
      %c0_95 = arith.constant 0 : index
      %157 = vector.load %arg7[%c0_94, %c0_95] : memref<1x32xf32, #tpu.memory_space<vmem>>, vector<1x32xf32>
      %cst_96 = arith.constant dense<0.000000e+00> : vector<8xf32>
      %158 = vector.multi_reduction <add>, %155, %cst_96 [1] : vector<8x32xf32> to vector<8xf32>
      %159 = vector.shape_cast %158 : vector<8xf32> to vector<8x1xf32>
      %cst_97 = arith.constant 3.200000e+01 : f32
      %160 = vector.broadcast %cst_97 : f32 to vector<8x1xf32>
      %161 = arith.divf %159, %160 : vector<8x1xf32>
      %162 = vector.broadcast %161 : vector<8x1xf32> to vector<8x32xf32>
      %163 = arith.subf %155, %162 : vector<8x32xf32>
      %164 = arith.mulf %163, %163 : vector<8x32xf32>
      %cst_98 = arith.constant dense<0.000000e+00> : vector<8xf32>
      %165 = vector.multi_reduction <add>, %164, %cst_98 [1] : vector<8x32xf32> to vector<8xf32>
      %166 = vector.shape_cast %165 : vector<8xf32> to vector<8x1xf32>
      %cst_99 = arith.constant 3.200000e+01 : f32
      %167 = vector.broadcast %cst_99 : f32 to vector<8x1xf32>
      %168 = arith.divf %166, %167 : vector<8x1xf32>
      %169 = vector.broadcast %161 : vector<8x1xf32> to vector<8x32xf32>
      %170 = arith.subf %155, %169 : vector<8x32xf32>
      %cst_100 = arith.constant 9.99999997E-7 : f32
      %171 = vector.broadcast %cst_100 : f32 to vector<8x1xf32>
      %172 = arith.addf %168, %171 : vector<8x1xf32>
      %173 = math.rsqrt %172 : vector<8x1xf32>
      %174 = vector.broadcast %173 : vector<8x1xf32> to vector<8x32xf32>
      %175 = arith.mulf %170, %174 : vector<8x32xf32>
      %176 = vector.broadcast %156 : vector<1x32xf32> to vector<8x32xf32>
      %177 = arith.mulf %175, %176 : vector<8x32xf32>
      %178 = vector.broadcast %157 : vector<1x32xf32> to vector<8x32xf32>
      %179 = arith.addf %177, %178 : vector<8x32xf32>
      %c0_101 = arith.constant 0 : index
      %c0_102 = arith.constant 0 : index
      %180 = vector.load %arg27[%c0_101, %c0_102] : memref<8x32xf32, #tpu.memory_space<vmem>>, vector<8x32xf32>
      tpu.vector_store %arg27[%c0_101, %c0_102], %179 {strides = array<i32>} : memref<8x32xf32, #tpu.memory_space<vmem>>, vector<8x32xf32>,
    } else {
    }
    %3 = arith.index_cast %arg0 : i32 to index
    %4 = memref.load %arg2[%3] : memref<2xi32, #tpu.memory_space<smem>>
    %5 = tpu.iota {dimensions = array<i32: 0>} : vector<8x8xi32>
    %6 = tpu.iota {dimensions = array<i32: 1>} : vector<8x8xi32>
    %7 = vector.broadcast %4 : i32 to vector<8x8xi32>
    %8 = arith.cmpi sge, %5, %7 : vector<8x8xi32>
    %9 = vector.broadcast %4 : i32 to vector<8x8xi32>
    %10 = arith.cmpi sge, %6, %9 : vector<8x8xi32>
    %11 = arith.andi %8, %10 : vector<8x8xi1>
    %c0 = arith.constant 0 : index
    %c0_1 = arith.constant 0 : index
    %12 = vector.load %arg27[%c0, %c0_1] : memref<8x32xf32, #tpu.memory_space<vmem>>, vector<8x32xf32>
    %c0_2 = arith.constant 0 : index
    %c0_3 = arith.constant 0 : index
    %c0_4 = arith.constant 0 : index
    %13 = vector.load %arg8[%c0_2, %c0_3, %c0_4] : memref<1x1x32xf32, #tpu.memory_space<vmem>>, vector<1x1x32xf32>
    %14 = vector.shape_cast %13 : vector<1x1x32xf32> to vector<1x32xf32>
    %c0_5 = arith.constant 0 : index
    %c0_6 = arith.constant 0 : index
    %c0_7 = arith.constant 0 : index
    %15 = vector.load %arg9[%c0_5, %c0_6, %c0_7] : memref<1x1x32xf32, #tpu.memory_space<vmem>>, vector<1x1x32xf32>
    %16 = vector.shape_cast %15 : vector<1x1x32xf32> to vector<1x32xf32>
    %cst = arith.constant dense<0.000000e+00> : vector<8xf32>
    %17 = vector.multi_reduction <add>, %12, %cst [1] : vector<8x32xf32> to vector<8xf32>
    %18 = vector.shape_cast %17 : vector<8xf32> to vector<8x1xf32>
    %cst_8 = arith.constant 3.200000e+01 : f32
    %19 = vector.broadcast %cst_8 : f32 to vector<8x1xf32>
    %20 = arith.divf %18, %19 : vector<8x1xf32>
    %21 = vector.broadcast %20 : vector<8x1xf32> to vector<8x32xf32>
    %22 = arith.subf %12, %21 : vector<8x32xf32>
    %23 = arith.mulf %22, %22 : vector<8x32xf32>
    %cst_9 = arith.constant dense<0.000000e+00> : vector<8xf32>
    %24 = vector.multi_reduction <add>, %23, %cst_9 [1] : vector<8x32xf32> to vector<8xf32>
    %25 = vector.shape_cast %24 : vector<8xf32> to vector<8x1xf32>
    %cst_10 = arith.constant 3.200000e+01 : f32
    %26 = vector.broadcast %cst_10 : f32 to vector<8x1xf32>
    %27 = arith.divf %25, %26 : vector<8x1xf32>
    %28 = vector.broadcast %20 : vector<8x1xf32> to vector<8x32xf32>
    %29 = arith.subf %12, %28 : vector<8x32xf32>
    %cst_11 = arith.constant 9.99999997E-7 : f32
    %30 = vector.broadcast %cst_11 : f32 to vector<8x1xf32>
    %31 = arith.addf %27, %30 : vector<8x1xf32>
    %32 = math.rsqrt %31 : vector<8x1xf32>
    %33 = vector.broadcast %32 : vector<8x1xf32> to vector<8x32xf32>
    %34 = arith.mulf %29, %33 : vector<8x32xf32>
    %35 = vector.broadcast %14 : vector<1x32xf32> to vector<8x32xf32>
    %36 = arith.mulf %34, %35 : vector<8x32xf32>
    %37 = vector.broadcast %16 : vector<1x32xf32> to vector<8x32xf32>
    %38 = arith.addf %36, %37 : vector<8x32xf32>
    %39 = arith.truncf %38 : vector<8x32xf32> to vector<8x32xbf16>
    %40 = vector.shape_cast %39 : vector<8x32xbf16> to vector<1x8x32xbf16>
    %41 = vector.shape_cast %40 : vector<1x8x32xbf16> to vector<1x8x32xbf16>
    %42 = vector.broadcast %41 : vector<1x8x32xbf16> to vector<4x8x32xbf16>
    %c0_12 = arith.constant 0 : index
    %c0_13 = arith.constant 0 : index
    %c0_14 = arith.constant 0 : index
    %c0_15 = arith.constant 0 : index
    %43 = vector.load %arg10[%c0_12, %c0_13, %c0_14, %c0_15] : memref<1x4x32x8xbf16, #tpu.memory_space<vmem>>, vector<1x4x32x8xbf16>
    %44 = vector.shape_cast %43 : vector<1x4x32x8xbf16> to vector<4x32x8xbf16>
    "tpu.trace_start"() <{level = 10 : i32, message = "htd,hdk->htk"}> : () -> ()
    %cst_16 = arith.constant dense<0.000000e+00> : vector<4x8x8xf32>
    %45 = tpu.matmul %42, %44, %cst_16 {dimension_numbers = #tpu.dot_dimension_numbers<[2], [1], [1], [2], [0, 0, 0, 1, 1, 2], [0], [0]>} : vector<4x8x32xbf16>, vector<4x32x8xbf16>, vector<4x8x8xf32> -> vector<4x8x8xf32>
    "tpu.trace_stop"() : () -> ()
    %c0_17 = arith.constant 0 : index
    %c0_18 = arith.constant 0 : index
    %c0_19 = arith.constant 0 : index
    %c0_20 = arith.constant 0 : index
    %46 = vector.load %arg11[%c0_17, %c0_18, %c0_19, %c0_20] : memref<1x4x1x8xf32, #tpu.memory_space<vmem>>, vector<1x4x1x8xf32>
    %47 = vector.shape_cast %46 : vector<1x4x1x8xf32> to vector<4x1x8xf32>
    %48 = vector.broadcast %47 : vector<4x1x8xf32> to vector<4x8x8xf32>
    %49 = arith.addf %45, %48 : vector<4x8x8xf32>
    %c0_21 = arith.constant 0 : index
    %c0_22 = arith.constant 0 : index
    %c0_23 = arith.constant 0 : index
    %c0_24 = arith.constant 0 : index
    %50 = vector.load %arg12[%c0_21, %c0_22, %c0_23, %c0_24] : memref<1x4x32x8xbf16, #tpu.memory_space<vmem>>, vector<1x4x32x8xbf16>
    %51 = vector.shape_cast %50 : vector<1x4x32x8xbf16> to vector<4x32x8xbf16>
    "tpu.trace_start"() <{level = 10 : i32, message = "htd,hdk->htk"}> : () -> ()
    %cst_25 = arith.constant dense<0.000000e+00> : vector<4x8x8xf32>
    %52 = tpu.matmul %42, %51, %cst_25 {dimension_numbers = #tpu.dot_dimension_numbers<[2], [1], [1], [2], [0, 0, 0, 1, 1, 2], [0], [0]>} : vector<4x8x32xbf16>, vector<4x32x8xbf16>, vector<4x8x8xf32> -> vector<4x8x8xf32>
    "tpu.trace_stop"() : () -> ()
    %c0_26 = arith.constant 0 : index
    %c0_27 = arith.constant 0 : index
    %c0_28 = arith.constant 0 : index
    %c0_29 = arith.constant 0 : index
    %53 = vector.load %arg13[%c0_26, %c0_27, %c0_28, %c0_29] : memref<1x4x1x8xf32, #tpu.memory_space<vmem>>, vector<1x4x1x8xf32>
    %54 = vector.shape_cast %53 : vector<1x4x1x8xf32> to vector<4x1x8xf32>
    %55 = vector.broadcast %54 : vector<4x1x8xf32> to vector<4x8x8xf32>
    %56 = arith.addf %52, %55 : vector<4x8x8xf32>
    %c0_30 = arith.constant 0 : index
    %c0_31 = arith.constant 0 : index
    %c0_32 = arith.constant 0 : index
    %c0_33 = arith.constant 0 : index
    %57 = vector.load %arg14[%c0_30, %c0_31, %c0_32, %c0_33] : memref<1x4x32x8xbf16, #tpu.memory_space<vmem>>, vector<1x4x32x8xbf16>
    %58 = vector.shape_cast %57 : vector<1x4x32x8xbf16> to vector<4x32x8xbf16>
    "tpu.trace_start"() <{level = 10 : i32, message = "htd,hdk->htk"}> : () -> ()
    %cst_34 = arith.constant dense<0.000000e+00> : vector<4x8x8xf32>
    %59 = tpu.matmul %42, %58, %cst_34 {dimension_numbers = #tpu.dot_dimension_numbers<[2], [1], [1], [2], [0, 0, 0, 1, 1, 2], [0], [0]>} : vector<4x8x32xbf16>, vector<4x32x8xbf16>, vector<4x8x8xf32> -> vector<4x8x8xf32>
    "tpu.trace_stop"() : () -> ()
    %c0_35 = arith.constant 0 : index
    %c0_36 = arith.constant 0 : index
    %c0_37 = arith.constant 0 : index
    %c0_38 = arith.constant 0 : index
    %60 = vector.load %arg15[%c0_35, %c0_36, %c0_37, %c0_38] : memref<1x4x1x8xf32, #tpu.memory_space<vmem>>, vector<1x4x1x8xf32>
    %61 = vector.shape_cast %60 : vector<1x4x1x8xf32> to vector<4x1x8xf32>
    %62 = vector.broadcast %61 : vector<4x1x8xf32> to vector<4x8x8xf32>
    %63 = arith.addf %59, %62 : vector<4x8x8xf32>
    %64 = arith.truncf %49 : vector<4x8x8xf32> to vector<4x8x8xbf16>
    %65 = arith.truncf %56 : vector<4x8x8xf32> to vector<4x8x8xbf16>
    "tpu.trace_start"() <{level = 10 : i32, message = "hqd,hkd->hqk"}> : () -> ()
    %cst_39 = arith.constant dense<0.000000e+00> : vector<4x8x8xf32>
    %66 = tpu.matmul %64, %65, %cst_39 {dimension_numbers = #tpu.dot_dimension_numbers<[2], [2], [1], [1], [0, 0, 0, 1, 1, 1], [0], [0]>} : vector<4x8x8xbf16>, vector<4x8x8xbf16>, vector<4x8x8xf32> -> vector<4x8x8xf32>
    "tpu.trace_stop"() : () -> ()
    %cst_40 = arith.constant 0.353553385 : f32
    %67 = vector.broadcast %cst_40 : f32 to vector<4x8x8xf32>
    %68 = arith.mulf %66, %67 : vector<4x8x8xf32>
    %69 = vector.shape_cast %11 : vector<8x8xi1> to vector<1x8x8xi1>
    %cst_41 = arith.constant -1.024000e+03 : f32
    %70 = vector.shape_cast %69 : vector<1x8x8xi1> to vector<1x8x8xi1>
    %71 = vector.broadcast %70 : vector<1x8x8xi1> to vector<4x8x8xi1>
    %72 = vector.broadcast %cst_41 : f32 to vector<4x8x8xf32>
    %73 = arith.select %71, %72, %68 : vector<4x8x8xi1>, vector<4x8x8xf32>
    %cst_42 = arith.constant dense<0xFF800000> : vector<4x8xf32>
    %74 = vector.multi_reduction <maximumf>, %73, %cst_42 [2] : vector<4x8x8xf32> to vector<4x8xf32>
    %75 = vector.shape_cast %74 : vector<4x8xf32> to vector<4x8x1xf32>
    %76 = vector.broadcast %75 : vector<4x8x1xf32> to vector<4x8x8xf32>
    %77 = arith.subf %73, %76 : vector<4x8x8xf32>
    %78 = math.exp %77 : vector<4x8x8xf32>
    %cst_43 = arith.constant dense<0.000000e+00> : vector<4x8xf32>
    %79 = vector.multi_reduction <add>, %78, %cst_43 [2] : vector<4x8x8xf32> to vector<4x8xf32>
    %80 = vector.shape_cast %79 : vector<4x8xf32> to vector<4x8x1xf32>
    %81 = tpu.reciprocal %80 {approx = true} : vector<4x8x1xf32> -> vector<4x8x1xf32>
    %82 = vector.broadcast %81 : vector<4x8x1xf32> to vector<4x8x8xf32>
    %83 = arith.mulf %78, %82 : vector<4x8x8xf32>
    %84 = arith.truncf %83 : vector<4x8x8xf32> to vector<4x8x8xbf16>
    %85 = arith.truncf %63 : vector<4x8x8xf32> to vector<4x8x8xbf16>
    "tpu.trace_start"() <{level = 10 : i32, message = "hqk,hkd->hqd"}> : () -> ()
    %cst_44 = arith.constant dense<0.000000e+00> : vector<4x8x8xf32>
    %86 = tpu.matmul %84, %85, %cst_44 {dimension_numbers = #tpu.dot_dimension_numbers<[2], [1], [1], [2], [0, 0, 0, 1, 1, 2], [0], [0]>} : vector<4x8x8xbf16>, vector<4x8x8xbf16>, vector<4x8x8xf32> -> vector<4x8x8xf32>
    "tpu.trace_stop"() : () -> ()
    %87 = arith.truncf %86 : vector<4x8x8xf32> to vector<4x8x8xbf16>
    %c0_45 = arith.constant 0 : index
    %c0_46 = arith.constant 0 : index
    %c0_47 = arith.constant 0 : index
    %c0_48 = arith.constant 0 : index
    %88 = vector.load %arg16[%c0_45, %c0_46, %c0_47, %c0_48] : memref<1x4x8x32xbf16, #tpu.memory_space<vmem>>, vector<1x4x8x32xbf16>
    %89 = vector.shape_cast %88 : vector<1x4x8x32xbf16> to vector<4x8x32xbf16>
    "tpu.trace_start"() <{level = 10 : i32, message = "hqd,hdm->hqm"}> : () -> ()
    %cst_49 = arith.constant dense<0.000000e+00> : vector<4x8x32xf32>
    %90 = tpu.matmul %87, %89, %cst_49 {dimension_numbers = #tpu.dot_dimension_numbers<[2], [1], [1], [2], [0, 0, 0, 1, 1, 2], [0], [0]>} : vector<4x8x8xbf16>, vector<4x8x32xbf16>, vector<4x8x32xf32> -> vector<4x8x32xf32>
    "tpu.trace_stop"() : () -> ()
    %cst_50 = arith.constant dense<0.000000e+00> : vector<8x32xf32>
    %91 = vector.multi_reduction <add>, %90, %cst_50 [0] : vector<4x8x32xf32> to vector<8x32xf32>
    %c0_51 = arith.constant 0 : index
    %c0_52 = arith.constant 0 : index
    %c0_53 = arith.constant 0 : index
    %92 = vector.load %arg17[%c0_51, %c0_52, %c0_53] : memref<1x1x32xf32, #tpu.memory_space<vmem>>, vector<1x1x32xf32>
    %93 = vector.shape_cast %92 : vector<1x1x32xf32> to vector<1x32xf32>
    %94 = vector.broadcast %93 : vector<1x32xf32> to vector<8x32xf32>
    %95 = arith.addf %91, %94 : vector<8x32xf32>
    %96 = arith.addf %12, %95 : vector<8x32xf32>
    %c0_54 = arith.constant 0 : index
    %c0_55 = arith.constant 0 : index
    %c0_56 = arith.constant 0 : index
    %97 = vector.load %arg18[%c0_54, %c0_55, %c0_56] : memref<1x1x32xf32, #tpu.memory_space<vmem>>, vector<1x1x32xf32>
    %98 = vector.shape_cast %97 : vector<1x1x32xf32> to vector<1x32xf32>
    %c0_57 = arith.constant 0 : index
    %c0_58 = arith.constant 0 : index
    %c0_59 = arith.constant 0 : index
    %99 = vector.load %arg19[%c0_57, %c0_58, %c0_59] : memref<1x1x32xf32, #tpu.memory_space<vmem>>, vector<1x1x32xf32>
    %100 = vector.shape_cast %99 : vector<1x1x32xf32> to vector<1x32xf32>
    %cst_60 = arith.constant dense<0.000000e+00> : vector<8xf32>
    %101 = vector.multi_reduction <add>, %96, %cst_60 [1] : vector<8x32xf32> to vector<8xf32>
    %102 = vector.shape_cast %101 : vector<8xf32> to vector<8x1xf32>
    %cst_61 = arith.constant 3.200000e+01 : f32
    %103 = vector.broadcast %cst_61 : f32 to vector<8x1xf32>
    %104 = arith.divf %102, %103 : vector<8x1xf32>
    %105 = vector.broadcast %104 : vector<8x1xf32> to vector<8x32xf32>
    %106 = arith.subf %96, %105 : vector<8x32xf32>
    %107 = arith.mulf %106, %106 : vector<8x32xf32>
    %cst_62 = arith.constant dense<0.000000e+00> : vector<8xf32>
    %108 = vector.multi_reduction <add>, %107, %cst_62 [1] : vector<8x32xf32> to vector<8xf32>
    %109 = vector.shape_cast %108 : vector<8xf32> to vector<8x1xf32>
    %cst_63 = arith.constant 3.200000e+01 : f32
    %110 = vector.broadcast %cst_63 : f32 to vector<8x1xf32>
    %111 = arith.divf %109, %110 : vector<8x1xf32>
    %112 = vector.broadcast %104 : vector<8x1xf32> to vector<8x32xf32>
    %113 = arith.subf %96, %112 : vector<8x32xf32>
    %cst_64 = arith.constant 9.99999997E-7 : f32
    %114 = vector.broadcast %cst_64 : f32 to vector<8x1xf32>
    %115 = arith.addf %111, %114 : vector<8x1xf32>
    %116 = math.rsqrt %115 : vector<8x1xf32>
    %117 = vector.broadcast %116 : vector<8x1xf32> to vector<8x32xf32>
    %118 = arith.mulf %113, %117 : vector<8x32xf32>
    %119 = vector.broadcast %98 : vector<1x32xf32> to vector<8x32xf32>
    %120 = arith.mulf %118, %119 : vector<8x32xf32>
    %121 = vector.broadcast %100 : vector<1x32xf32> to vector<8x32xf32>
    %122 = arith.addf %120, %121 : vector<8x32xf32>
    %123 = arith.truncf %122 : vector<8x32xf32> to vector<8x32xbf16>
    %c0_65 = arith.constant 0 : index
    %c0_66 = arith.constant 0 : index
    %c0_67 = arith.constant 0 : index
    %124 = vector.load %arg20[%c0_65, %c0_66, %c0_67] : memref<1x32x64xbf16, #tpu.memory_space<vmem>>, vector<1x32x64xbf16>
    %125 = vector.shape_cast %124 : vector<1x32x64xbf16> to vector<32x64xbf16>
    %cst_68 = arith.constant dense<0.000000e+00> : vector<8x64xf32>
    %126 = tpu.matmul %123, %125, %cst_68 {dimension_numbers = #tpu.dot_dimension_numbers<[1], [0], [0], [1], [0, 0, 1, 1], [], []>} : vector<8x32xbf16>, vector<32x64xbf16>, vector<8x64xf32> -> vector<8x64xf32>
    %c0_69 = arith.constant 0 : index
    %c0_70 = arith.constant 0 : index
    %c0_71 = arith.constant 0 : index
    %127 = vector.load %arg21[%c0_69, %c0_70, %c0_71] : memref<1x1x64xf32, #tpu.memory_space<vmem>>, vector<1x1x64xf32>
    %128 = vector.shape_cast %127 : vector<1x1x64xf32> to vector<1x64xf32>
    %129 = vector.broadcast %128 : vector<1x64xf32> to vector<8x64xf32>
    %130 = arith.addf %126, %129 : vector<8x64xf32>
    %cst_72 = arith.constant 0.000000e+00 : f32
    %131 = vector.broadcast %cst_72 : f32 to vector<8x64xf32>
    %132 = arith.maximumf %130, %131 : vector<8x64xf32>
    %133 = arith.truncf %132 : vector<8x64xf32> to vector<8x64xbf16>
    %c0_73 = arith.constant 0 : index
    %c0_74 = arith.constant 0 : index
    %c0_75 = arith.constant 0 : index
    %134 = vector.load %arg22[%c0_73, %c0_74, %c0_75] : memref<1x64x32xbf16, #tpu.memory_space<vmem>>, vector<1x64x32xbf16>
    %135 = vector.shape_cast %134 : vector<1x64x32xbf16> to vector<64x32xbf16>
    %cst_76 = arith.constant dense<0.000000e+00> : vector<8x32xf32>
    %136 = tpu.matmul %133, %135, %cst_76 {dimension_numbers = #tpu.dot_dimension_numbers<[1], [0], [0], [1], [0, 0, 1, 1], [], []>} : vector<8x64xbf16>, vector<64x32xbf16>, vector<8x32xf32> -> vector<8x32xf32>
    %c0_77 = arith.constant 0 : index
    %c0_78 = arith.constant 0 : index
    %c0_79 = arith.constant 0 : index
    %137 = vector.load %arg23[%c0_77, %c0_78, %c0_79] : memref<1x1x32xf32, #tpu.memory_space<vmem>>, vector<1x1x32xf32>
    %138 = vector.shape_cast %137 : vector<1x1x32xf32> to vector<1x32xf32>
    %139 = vector.broadcast %138 : vector<1x32xf32> to vector<8x32xf32>
    %140 = arith.addf %136, %139 : vector<8x32xf32>
    %141 = arith.addf %96, %140 : vector<8x32xf32>
    %c0_80 = arith.constant 0 : index
    %c0_81 = arith.constant 0 : index
    %142 = vector.load %arg27[%c0_80, %c0_81] : memref<8x32xf32, #tpu.memory_space<vmem>>, vector<8x32xf32>
    tpu.vector_store %arg27[%c0_80, %c0_81], %141 {strides = array<i32>} : memref<8x32xf32, #tpu.memory_space<vmem>>, vector<8x32xf32>,
    %c1_i32 = arith.constant 1 : i32
    %143 = arith.cmpi eq, %arg1, %c1_i32 : i32
    %144 = arith.extui %143 : i1 to i32
    %c0_i32_82 = arith.constant 0 : i32
    %145 = arith.cmpi ne, %144, %c0_i32_82 : i32
    scf.if %145 {
      %c0_83 = arith.constant 0 : index
      %c0_84 = arith.constant 0 : index
      %146 = vector.load %arg24[%c0_83, %c0_84] : memref<1x32xf32, #tpu.memory_space<vmem>>, vector<1x32xf32>
      %c0_85 = arith.constant 0 : index
      %c0_86 = arith.constant 0 : index
      %147 = vector.load %arg25[%c0_85, %c0_86] : memref<1x32xf32, #tpu.memory_space<vmem>>, vector<1x32xf32>
      %cst_87 = arith.constant dense<0.000000e+00> : vector<8xf32>
      %148 = vector.multi_reduction <add>, %141, %cst_87 [1] : vector<8x32xf32> to vector<8xf32>
      %149 = vector.shape_cast %148 : vector<8xf32> to vector<8x1xf32>
      %cst_88 = arith.constant 3.200000e+01 : f32
      %150 = vector.broadcast %cst_88 : f32 to vector<8x1xf32>
      %151 = arith.divf %149, %150 : vector<8x1xf32>
      %152 = vector.broadcast %151 : vector<8x1xf32> to vector<8x32xf32>
      %153 = arith.subf %141, %152 : vector<8x32xf32>
      %154 = arith.mulf %153, %153 : vector<8x32xf32>
      %cst_89 = arith.constant dense<0.000000e+00> : vector<8xf32>
      %155 = vector.multi_reduction <add>, %154, %cst_89 [1] : vector<8x32xf32> to vector<8xf32>
      %156 = vector.shape_cast %155 : vector<8xf32> to vector<8x1xf32>
      %cst_90 = arith.constant 3.200000e+01 : f32
      %157 = vector.broadcast %cst_90 : f32 to vector<8x1xf32>
      %158 = arith.divf %156, %157 : vector<8x1xf32>
      %159 = vector.broadcast %151 : vector<8x1xf32> to vector<8x32xf32>
      %160 = arith.subf %141, %159 : vector<8x32xf32>
      %cst_91 = arith.constant 9.99999997E-7 : f32
      %161 = vector.broadcast %cst_91 : f32 to vector<8x1xf32>
      %162 = arith.addf %158, %161 : vector<8x1xf32>
      %163 = math.rsqrt %162 : vector<8x1xf32>
      %164 = vector.broadcast %163 : vector<8x1xf32> to vector<8x32xf32>
      %165 = arith.mulf %160, %164 : vector<8x32xf32>
      %166 = vector.broadcast %146 : vector<1x32xf32> to vector<8x32xf32>
      %167 = arith.mulf %165, %166 : vector<8x32xf32>
      %168 = vector.broadcast %147 : vector<1x32xf32> to vector<8x32xf32>
      %169 = arith.addf %167, %168 : vector<8x32xf32>
      %c0_92 = arith.constant 0 : index
      %c0_93 = arith.constant 0 : index
      %c0_94 = arith.constant 0 : index
      %170 = vector.load %arg26[%c0_92, %c0_93, %c0_94] : memref<1x8x32xf32, #tpu.memory_space<vmem>>, vector<1x8x32xf32>
      %171 = vector.shape_cast %170 : vector<1x8x32xf32> to vector<8x32xf32>
      %172 = vector.shape_cast %169 : vector<8x32xf32> to vector<1x8x32xf32>
      tpu.vector_store %arg26[%c0_92, %c0_93, %c0_94], %172 {strides = array<i32>} : memref<1x8x32xf32, #tpu.memory_space<vmem>>, vector<1x8x32xf32>,
    } else {
    }
    return
  }
  func.func @transform_0(%arg0: i32, %arg1: i32, %arg2: memref<2xi32, #tpu.memory_space<smem>>) -> (i32, i32, i32) {
    %c0_i32 = arith.constant 0 : i32
    %c0_i32_0 = arith.constant 0 : i32
    %c0_i32_1 = arith.constant 0 : i32
    return %arg0, %c0_i32, %c0_i32_0 : i32, i32, i32
  }
  func.func @transform_1(%arg0: i32, %arg1: i32, %arg2: memref<2xi32, #tpu.memory_space<smem>>) -> (i32, i32) {
    %c0_i32 = arith.constant 0 : i32
    %c0_i32_0 = arith.constant 0 : i32
    %c0_i32_1 = arith.constant 0 : i32
    return %c0_i32, %c0_i32_0 : i32, i32
  }
  func.func @transform_2(%arg0: i32, %arg1: i32, %arg2: memref<2xi32, #tpu.memory_space<smem>>) -> (i32, i32) {
    %c0_i32 = arith.constant 0 : i32
    %c0_i32_0 = arith.constant 0 : i32
    %c0_i32_1 = arith.constant 0 : i32
    return %c0_i32, %c0_i32_0 : i32, i32
  }
  func.func @transform_3(%arg0: i32, %arg1: i32, %arg2: memref<2xi32, #tpu.memory_space<smem>>) -> (i32, i32) {
    %c0_i32 = arith.constant 0 : i32
    %c0_i32_0 = arith.constant 0 : i32
    %c0_i32_1 = arith.constant 0 : i32
    return %c0_i32, %c0_i32_0 : i32, i32
  }
  func.func @transform_4(%arg0: i32, %arg1: i32, %arg2: memref<2xi32, #tpu.memory_space<smem>>) -> (i32, i32) {
    %c0_i32 = arith.constant 0 : i32
    %c0_i32_0 = arith.constant 0 : i32
    %c0_i32_1 = arith.constant 0 : i32
    return %c0_i32, %c0_i32_0 : i32, i32
  }
  func.func @transform_5(%arg0: i32, %arg1: i32, %arg2: memref<2xi32, #tpu.memory_space<smem>>) -> (i32, i32, i32) {
    %c0_i32 = arith.constant 0 : i32
    %c0_i32_0 = arith.constant 0 : i32
    %c0_i32_1 = arith.constant 0 : i32
    return %arg1, %c0_i32, %c0_i32_0 : i32, i32, i32
  }
  func.func @transform_6(%arg0: i32, %arg1: i32, %arg2: memref<2xi32, #tpu.memory_space<smem>>) -> (i32, i32, i32) {
    %c0_i32 = arith.constant 0 : i32
    %c0_i32_0 = arith.constant 0 : i32
    %c0_i32_1 = arith.constant 0 : i32
    return %arg1, %c0_i32, %c0_i32_0 : i32, i32, i32
  }
  func.func @transform_7(%arg0: i32, %arg1: i32, %arg2: memref<2xi32, #tpu.memory_space<smem>>) -> (i32, i32, i32, i32) {
    %c0_i32 = arith.constant 0 : i32
    %c0_i32_0 = arith.constant 0 : i32
    %c0_i32_1 = arith.constant 0 : i32
    %c0_i32_2 = arith.constant 0 : i32
    return %arg1, %c0_i32, %c0_i32_0, %c0_i32_1 : i32, i32, i32, i32
  }
  func.func @transform_8(%arg0: i32, %arg1: i32, %arg2: memref<2xi32, #tpu.memory_space<smem>>) -> (i32, i32, i32, i32) {
    %c0_i32 = arith.constant 0 : i32
    %c0_i32_0 = arith.constant 0 : i32
    %c0_i32_1 = arith.constant 0 : i32
    %c0_i32_2 = arith.constant 0 : i32
    return %arg1, %c0_i32, %c0_i32_0, %c0_i32_1 : i32, i32, i32, i32
  }
  func.func @transform_9(%arg0: i32, %arg1: i32, %arg2: memref<2xi32, #tpu.memory_space<smem>>) -> (i32, i32, i32, i32) {
    %c0_i32 = arith.constant 0 : i32
    %c0_i32_0 = arith.constant 0 : i32
    %c0_i32_1 = arith.constant 0 : i32
    %c0_i32_2 = arith.constant 0 : i32
    return %arg1, %c0_i32, %c0_i32_0, %c0_i32_1 : i32, i32, i32, i32
  }
  func.func @transform_10(%arg0: i32, %arg1: i32, %arg2: memref<2xi32, #tpu.memory_space<smem>>) -> (i32, i32, i32, i32) {
    %c0_i32 = arith.constant 0 : i32
    %c0_i32_0 = arith.constant 0 : i32
    %c0_i32_1 = arith.constant 0 : i32
    %c0_i32_2 = arith.constant 0 : i32
    return %arg1, %c0_i32, %c0_i32_0, %c0_i32_1 : i32, i32, i32, i32
  }
  func.func @transform_11(%arg0: i32, %arg1: i32, %arg2: memref<2xi32, #tpu.memory_space<smem>>) -> (i32, i32, i32, i32) {
    %c0_i32 = arith.constant 0 : i32
    %c0_i32_0 = arith.constant 0 : i32
    %c0_i32_1 = arith.constant 0 : i32
    %c0_i32_2 = arith.constant 0 : i32
    return %arg1, %c0_i32, %c0_i32_0, %c0_i32_1 : i32, i32, i32, i32
  }
  func.func @transform_12(%arg0: i32, %arg1: i32, %arg2: memref<2xi32, #tpu.memory_space<smem>>) -> (i32, i32, i32, i32) {
    %c0_i32 = arith.constant 0 : i32
    %c0_i32_0 = arith.constant 0 : i32
    %c0_i32_1 = arith.constant 0 : i32
    %c0_i32_2 = arith.constant 0 : i32
    return %arg1, %c0_i32, %c0_i32_0, %c0_i32_1 : i32, i32, i32, i32
  }
  func.func @transform_13(%arg0: i32, %arg1: i32, %arg2: memref<2xi32, #tpu.memory_space<smem>>) -> (i32, i32, i32, i32) {
    %c0_i32 = arith.constant 0 : i32
    %c0_i32_0 = arith.constant 0 : i32
    %c0_i32_1 = arith.constant 0 : i32
    %c0_i32_2 = arith.constant 0 : i32
    return %arg1, %c0_i32, %c0_i32_0, %c0_i32_1 : i32, i32, i32, i32
  }
  func.func @transform_14(%arg0: i32, %arg1: i32, %arg2: memref<2xi32, #tpu.memory_space<smem>>) -> (i32, i32, i32) {
    %c0_i32 = arith.constant 0 : i32
    %c0_i32_0 = arith.constant 0 : i32
    %c0_i32_1 = arith.constant 0 : i32
    return %arg1, %c0_i32, %c0_i32_0 : i32, i32, i32
  }
  func.func @transform_15(%arg0: i32, %arg1: i32, %arg2: memref<2xi32, #tpu.memory_space<smem>>) -> (i32, i32, i32) {
    %c0_i32 = arith.constant 0 : i32
    %c0_i32_0 = arith.constant 0 : i32
    %c0_i32_1 = arith.constant 0 : i32
    return %arg1, %c0_i32, %c0_i32_0 : i32, i32, i32
  }
  func.func @transform_16(%arg0: i32, %arg1: i32, %arg2: memref<2xi32, #tpu.memory_space<smem>>) -> (i32, i32, i32) {
    %c0_i32 = arith.constant 0 : i32
    %c0_i32_0 = arith.constant 0 : i32
    %c0_i32_1 = arith.constant 0 : i32
    return %arg1, %c0_i32, %c0_i32_0 : i32, i32, i32
  }
  func.func @transform_17(%arg0: i32, %arg1: i32, %arg2: memref<2xi32, #tpu.memory_space<smem>>) -> (i32, i32, i32) {
    %c0_i32 = arith.constant 0 : i32
    %c0_i32_0 = arith.constant 0 : i32
    %c0_i32_1 = arith.constant 0 : i32
    return %arg1, %c0_i32, %c0_i32_0 : i32, i32, i32
  }
  func.func @transform_18(%arg0: i32, %arg1: i32, %arg2: memref<2xi32, #tpu.memory_space<smem>>) -> (i32, i32, i32) {
    %c0_i32 = arith.constant 0 : i32
    %c0_i32_0 = arith.constant 0 : i32
    %c0_i32_1 = arith.constant 0 : i32
    return %arg1, %c0_i32, %c0_i32_0 : i32, i32, i32
  }
  func.func @transform_19(%arg0: i32, %arg1: i32, %arg2: memref<2xi32, #tpu.memory_space<smem>>) -> (i32, i32, i32) {
    %c0_i32 = arith.constant 0 : i32
    %c0_i32_0 = arith.constant 0 : i32
    %c0_i32_1 = arith.constant 0 : i32
    return %arg1, %c0_i32, %c0_i32_0 : i32, i32, i32
  }
  func.func @transform_20(%arg0: i32, %arg1: i32, %arg2: memref<2xi32, #tpu.memory_space<smem>>) -> (i32, i32, i32) {
    %c0_i32 = arith.constant 0 : i32
    %c0_i32_0 = arith.constant 0 : i32
    %c0_i32_1 = arith.constant 0 : i32
    return %arg1, %c0_i32, %c0_i32_0 : i32, i32, i32
  }
  func.func @transform_21(%arg0: i32, %arg1: i32, %arg2: memref<2xi32, #tpu.memory_space<smem>>) -> (i32, i32) {
    %c0_i32 = arith.constant 0 : i32
    %c0_i32_0 = arith.constant 0 : i32
    %c0_i32_1 = arith.constant 0 : i32
    return %c0_i32, %c0_i32_0 : i32, i32
  }
  func.func @transform_22(%arg0: i32, %arg1: i32, %arg2: memref<2xi32, #tpu.memory_space<smem>>) -> (i32, i32) {
    %c0_i32 = arith.constant 0 : i32
    %c0_i32_0 = arith.constant 0 : i32
    %c0_i32_1 = arith.constant 0 : i32
    return %c0_i32, %c0_i32_0 : i32, i32
  }
  func.func @transform_23(%arg0: i32, %arg1: i32, %arg2: memref<2xi32, #tpu.memory_space<smem>>) -> (i32, i32, i32) {
    %c0_i32 = arith.constant 0 : i32
    %c0_i32_0 = arith.constant 0 : i32
    %c0_i32_1 = arith.constant 0 : i32
    return %arg0, %c0_i32, %c0_i32_0 : i32, i32, i32
  }
}

</mosaic_0001>

<bundles_post_ra>
// kernel: tpu_custom_call.1
= control target key start
LH: loop header
LB: loop body
LE: loop exit
PB: predicated region body
PF: predicated region fallthrough
CT: control target
= control target key end

     0   :  { %s4271_s0 = inlined_call_operand.vmem [shape: s32[2], index: 0, kind: input, shape index: {}]   ;;  %s4272_s1 = inlined_call_operand.vmem [shape: f32[2,8,16], index: 1, kind: input, shape index: {}]   ;;  %s4273_s2 = inlined_call_operand.vmem [shape: bf16[16,32], index: 2, kind: input, shape index: {}]   ;;  %s4274_s3 = inlined_call_operand.vmem [shape: f32[1,32], index: 3, kind: input, shape index: {}]   ;;  %s4275_s4 = inlined_call_operand.vmem [shape: f32[1,32], index: 4, kind: input, shape index: {}]   ;;  %s4276_s5 = inlined_call_operand.vmem [shape: f32[1,32], index: 5, kind: input, shape index: {}]   ;;  %s4277_s6 = inlined_call_operand.vmem [shape: f32[2,1,32], index: 6, kind: input, shape index: {}]   ;;  %s4278_s7 = inlined_call_operand.vmem [shape: f32[2,1,32], index: 7, kind: input, shape index: {}]   ;;  %s4279_s8 = inlined_call_operand.vmem [shape: bf16[2,4,32,8], index: 8, kind: input, shape index: {}]   ;;  %s4280_s9 = inlined_call_operand.vmem [shape: f32[2,4,1,8], index: 9, kind: input, shape index: {}]   ;;  %s4281_s10 = inlined_call_operand.vmem [shape: bf16[2,4,32,8], index: 10, kind: input, shape index: {}]   ;;  %s4282_s11 = inlined_call_operand.vmem [shape: f32[2,4,1,8], index: 11, kind: input, shape index: {}]   ;;  %s4283_s12 = inlined_call_operand.vmem [shape: bf16[2,4,32,8], index: 12, kind: input, shape index: {}]   ;;  %s4284_s13 = inlined_call_operand.vmem [shape: f32[2,4,1,8], index: 13, kind: input, shape index: {}]   ;;  %s4285_s14 = inlined_call_operand.vmem [shape: bf16[2,4,8,32], index: 14, kind: input, shape index: {}]   ;;  %s4286_s15 = inlined_call_operand.vmem [shape: f32[2,1,32], index: 15, kind: input, shape index: {}]   ;;  %s4287_s16 = inlined_call_operand.vmem [shape: f32[2,1,32], index: 16, kind: input, shape index: {}]   ;;  %s4288_s17 = inlined_call_operand.vmem [shape: f32[2,1,32], index: 17, kind: input, shape index: {}]   ;;  %s4289_s18 = inlined_call_operand.vmem [shape: bf16[2,32,64], index: 18, kind: input, shape index: {}]   ;;  %s4290_s19 = inlined_call_operand.vmem [shape: f32[2,1,64], index: 19, kind: input, shape index: {}]   ;;  %s4291_s20 = inlined_call_operand.vmem [shape: bf16[2,64,32], index: 20, kind: input, shape index: {}]   ;;  %s4292_s21 = inlined_call_operand.vmem [shape: f32[2,1,32], index: 21, kind: input, shape index: {}]   ;;  %s4293_s22 = inlined_call_operand.vmem [shape: f32[1,32], index: 22, kind: input, shape index: {}]   ;;  %s4294_s23 = inlined_call_operand.vmem [shape: f32[1,32], index: 23, kind: input, shape index: {}]   ;;  %s4295_s24 = inlined_call_operand.hbm [shape: f32[2,8,32], index: 24, kind: output, shape index: {}]  }
   0x1   :  { %4313 = sst [smem:[#allocation24_spill]] %s4271_s0 }
   0x2   :  { %4314 = sst [smem:[#allocation25_spill]] %s4272_s1 }
   0x3   :  { %4315 = sst [smem:[#allocation26_spill]] %s4273_s2 }
   0x4   :  { %4316 = sst [smem:[#allocation27_spill]] %s4274_s3 }
   0x5   :  { %4317 = sst [smem:[#allocation28_spill]] %s4275_s4 }
   0x6   :  { %4318 = sst [smem:[#allocation29_spill]] %s4276_s5 }
   0x7   :  { %4319 = sst [smem:[#allocation30_spill]] %s4277_s6 }
   0x8   :  { %4320 = sst [smem:[#allocation31_spill]] %s4278_s7 }
   0x9   :  { %4321 = sst [smem:[#allocation32_spill]] %s4279_s8 }
   0xa   :  { %4322 = sst [smem:[#allocation33_spill]] %s4280_s9 }
   0xb   :  { %4323 = sst [smem:[#allocation34_spill]] %s4281_s10 }
   0xc   :  { %4324 = sst [smem:[#allocation35_spill]] %s4282_s11 }
   0xd   :  { %4325 = sst [smem:[#allocation36_spill]] %s4283_s12 }
   0xe   :  { %4326 = sst [smem:[#allocation37_spill]] %s4284_s13 }
   0xf   :  { %4327 = sst [smem:[#allocation38_spill]] %s4285_s14 }
  0x10   :  { %4328 = sst [smem:[#allocation39_spill]] %s4287_s16 }
  0x11   :  { %4329 = sst [smem:[#allocation40_spill]] %s4289_s18 }
  0x12   :  { %4330 = sst [smem:[#allocation41_spill]] %s4291_s20 }
  0x13   :  { %4331 = sst [smem:[#allocation42_spill]] %s4293_s22 }
  0x14   :  { %4332 = sst [smem:[#allocation43_spill]] %s4294_s23 }
  0x15   :  { %4333 = sst [smem:[#allocation44_spill]] %s4295_s24 }
  0x16   :  { %s4334_s27 = sld [smem:[#allocation24_spill]] }
  0x1c   :  { %s29_s18 = sshll.u32 %s4334_s27, 4  ;;  %s30_s18 = int_to_ptr.vmem [resolvable:$true] %s29_s18 }
  0x1d   :  { %s3525_s28 = scalar_lea.vmem %s30_s18, 16  ;;  %p3530_p1 = scmp.lt.s32.totalorder %s30_s18, %s30_s18 }
  0x1e   :  { %p3526_p0 = scmp.ne.s32.totalorder %s30_s18, %s3525_s28  ;;  %p3531_p2 = scmp.lt.s32.totalorder %s3525_s28, %s3525_s28 }
  0x20   :  { %p3532_p3 = por %p3531_p2, %p3530_p1 }
  0x22   :  { %p3533_p4 = pnand %p3532_p3, %p3526_p0 }
  0x24   :  { %3536 = shalt.err (!%p3533_p4)  }
  0x25   :  { %s3633_s6 = smov [#allocation4]  }
  0x26   :  { %32 = dma.vmem_to_smem %s30_s18, 16, %s3633_s6, [#allocation3] }
  0x27   :  { %3595 = dma.done.wait [#allocation3], 16 }
  0x28   :  { %3596 = vsyncadd [#allocation3], 4294967280 }
  0x29   :  { %34 = sfence }
  0x2a   :  { %35 = vsyncpa [#allocation6], 0 }
  0x2b   :  { %37 = vsyncpa [#allocation6 + $0x1], 0  ;;  %s3767_s2 = smov 0   ;;  %s3769_s29 = smov 0  }
  0x2c   :  { %s3771_s0 = smov 0   ;;  %s3773_s7 = smov 0  }
  0x2d   :  { %s3775_s30 = smov 0   ;;  %s3777_s3 = smov 0  }
  0x2e   :  { %s3779_s25 = smov 0   ;;  %s3781_s18 = smov 0  }
  0x2f LB: > { %4335 = sst [smem:[#allocation9_spill]] %s3603_s2  ;;  %s3014_s8 = sadd.s32 4294967295, %s3631_s18   ;;  %s3631_s18 = sphi %s3781_s18, %s43_s18   ;;  %s3627_s25 = sphi %s3779_s25, %s4399_s25   ;;  %s3623_s3 = sphi %s3777_s3, %s4398_s3   ;;  %s3619_s30 = sphi %s3775_s30, %s4397_s30   ;;  %s3615_s7 = sphi %s3773_s7, %s4396_s7   ;;  %s3611_s0 = sphi %s3771_s0, %s4395_s0   ;;  %s3607_s29 = sphi %s3769_s29, %s4394_s29   ;;  %s3603_s2 = sphi %s3767_s2, %s4393_s2  }
  0x30   : > { %4336 = sst [smem:[#allocation10_spill]] %s3607_s29  ;;  %s3015_s4 = sadd.s32 4294967294, %s3631_s18  }
  0x31   : > { %4337 = sst [smem:[#allocation11_spill]] %s3611_s0  ;;  %s52_s1 = sadd.s32 1, %s3623_s3 }
  0x32   : > { %4338 = sst [smem:[#allocation12_spill]] %s3615_s7  ;;  %p53_p5 = scmp.ge.s32.totalorder %s52_s1, 2 }
  0x33   : > { %4339 = sst [smem:[#allocation13_spill]] %s3619_s30  ;;  %s55_s5 = sadd.s32 1, %s3627_s25 }
  0x34   : > { %4340 = sst [smem:[#allocation14_spill]] %s3623_s3  ;;  %p640_p6 = scmp.ne.s32.totalorder %s3611_s0, %s3607_s29 }
  0x35   : > { %4341 = sst [smem:[#allocation15_spill]] %s3627_s25  ;;  %p641_p7 = scmp.eq.s32.totalorder %s3014_s8, 3 }
  0x36   : > { %4342 = sst [smem:[#allocation16_spill]] %s3631_s18  ;;  %s4401_s1 = smov (%p53_p5, %s52_s1), 0 }
  0x37   : > { %4343 = sst [smem:[#allocation17_spill]] %s4401_s1  ;;  %s4403_s5 = smov (!%p53_p5, %s55_s5), %s3627_s25 }
  0x38   : > { %p3816_p8 = por %p641_p7, %p640_p6  ;;  %p646_p9 = scmp.ne.s32.totalorder %s3607_s29, %s3603_s2 }
  0x39   : > { %p57_p10 = scmp.ge.s32.totalorder %s4403_s5, 2  ;;  %p647_p11 = scmp.eq.s32.totalorder %s3015_s4, 3 }
  0x3a   : > { %s4344_s26 = scalar_select %p3816_p8, 1, 0 }
  0x3b   : > { %p3018_p12 = scmp.ge.s32.totalorder %s3631_s18, 1  ;;  %p801_p13 = scmp.lt.s32.totalorder %s3631_s18, 5 }
  0x3c   : > { %4345 = sst [smem:[#allocation18_spill]] %s4344_s26  ;;  %s4405_s5 = smov (%p57_p10, %s4403_s5), 0 }
  0x3d   : > { %4346 = sst [smem:[#allocation19_spill]] %s4405_s5  ;;  %p3826_p0 = por %p647_p11, %p646_p9 }
  0x3e   : > { %p802_p1 = pnand %p3018_p12, %p801_p13  ;;  %s627_s28 = ssub.s32 %s3627_s25, %s4405_s5 }
  0x3f   : > { %s4347_s27 = scalar_select %p3826_p0, 1, 0 }
  0x40   : > { %s630_s6 = sadd.s32 1, %s3611_s0  ;;  %p628_p2 = scmp.eq.s32.totalorder %s627_s28, 0 }
  0x41   : > { %4348 = sst [smem:[#allocation20_spill]] %s4347_s27  ;;  %805 = sbr.rel (%p802_p1) target bundleno = 3105 (0xc21), region = 112 }
  0x42   : > { %s3834_s8 = scalar_select %p628_p2, %s3611_s0, %s630_s6  }
  0x44   : > { %4349 = sst [smem:[#allocation21_spill]] %s3834_s8 }
  0x46   : > { %s4301_s4 = sand.u32 1, %s3607_s29   ;;  %p927_p3 = scmp.lt.s32.totalorder %s3619_s30, 1 }
  0x47   : > { %s3840_s1 = sshll.u32 %s4301_s4, 3  ;;  %p931_p4 = scmp.lt.s32.totalorder %s3615_s7, 1 }
  0x48   : > { %s928_s3 = scalar_select %p927_p3, %s3619_s30, 1 }
  0x49   : > { %s3845_s27 = scalar_select %p931_p4, %s3615_s7, 1 }
  0x4a   : > { %s3020_s28 = sshll.u32 %s928_s3, 3  ;;  %s4350_s25 = sld [smem:[#allocation25_spill]] }
  0x4b   : > { %s3124_s22 = sshll.u32 %s3845_s27, 6  ;;  %s4353_s20 = sld [smem:[#allocation32_spill]] }
  0x4c   : > { %s3023_s5 = sshll.u32 %s3845_s27, 2  ;;  %s4354_s9 = sld [smem:[#allocation33_spill]] }
  0x4d   : > { %s4356_s10 = sld [smem:[#allocation34_spill]]  ;;  %s3127_s18 = sshll.u32 %s3845_s27, 4 }
  0x4e   : > { %s4357_s11 = sld [smem:[#allocation35_spill]]  ;;  %s977_s23 = scalar_lea.vmem %s4288_s17, %s3845_s27 }
  0x4f   : > { %s4358_s12 = sld [smem:[#allocation36_spill]]  ;;  %s993_s26 = scalar_lea.vmem %s4292_s21, %s3845_s27 }
  0x50   : > { %s930_s8 = scalar_lea.vmem %s4350_s25, %s3020_s28  ;;  %s4359_s13 = sld [smem:[#allocation37_spill]] }
  0x51   : > { %s3862_s3 = scalar_lea.vmem %s4353_s20, %s3124_s22  ;;  %s4360_s14 = sld [smem:[#allocation38_spill]] }
  0x52   : > { %s3868_s0 = scalar_lea.vmem %s4354_s9, %s3023_s5  ;;  %s926_s7 = scalar_lea.vmem [#allocation5], %s3840_s1 }
  0x53   : > { %4355 = sst [smem:[#allocation22_spill]] %s3868_s0  ;;  %s3873_s24 = scalar_lea.vmem %s4356_s10, %s3124_s22 }
  0x54   : > { %s3878_s28 = scalar_lea.vmem %s4357_s11, %s3023_s5  ;;  %s4365_s20 = sld [smem:[#allocation12_spill]] }
  0x55   : > { %s3883_s30 = scalar_lea.vmem %s4358_s12, %s3124_s22  ;;  %s4363_s12 = sld [smem:[#allocation40_spill]] }
  0x56   : > { %s3888_s25 = scalar_lea.vmem %s4359_s13, %s3023_s5  ;;  %s4364_s22 = sld [smem:[#allocation41_spill]] }
  0x57   : > { %s3894_s4 = scalar_lea.vmem %s4360_s14, %s3127_s18  ;;  %s985_s14 = scalar_lea.vmem %s4290_s19, %s3845_s27 }
  0x58   : > { %4361 = sst [smem:[#allocation23_spill]] %s3894_s4  ;;  %s3129_s4 = sshll.u32 %s3845_s27, 5 }
  0x5a   : > { %p3036_p5 = scmp.ne.s32.totalorder %s4365_s20, 0 }
  0x5b   : > { %s3911_s13 = scalar_lea.vmem %s4363_s12, %s3127_s18  ;;  %s4366_s5 = sld [smem:[#allocation26_spill]] (!%p3036_p5) }
  0x5c   : > { %s3925_s16 = scalar_lea.vmem %s4364_s22, %s3129_s4  ;;  %998 = sbr.rel (%p3036_p5) target bundleno = 608 (0x260), region = 116 }
  0x5d   : > { %s4367_s22 = sld [smem:[#allocation27_spill]] (!%p3036_p5) }
  0x5e   : > { %s4368_s2 = sld [smem:[#allocation28_spill]] (!%p3036_p5) }
  0x5f   : > { %s4369_s11 = sld [smem:[#allocation29_spill]] (!%p3036_p5) }
  0x61   : > { %v3470_v0 = vld [vmem:[%s4366_s5] sm:$0xff]   ;;  %v3634_v1 = vmov 0.0   ;;  %vm3635_vm0 = vmmov 0   ;;  %vm1016_vm1 = vcmask 130048   ;;  %vm1063_vm2 = vcmask 261120  }
  0x62   : > { %3200 = vmatprep.subr.bf16.mxu0 %v3634_v1  ;;  %v999_v2 = vld [vmem:[%s930_s8] sm:$0xff]  ;;  %3202 = vmatprep.mubr.msk.bf16.mxu0 %vm3635_vm0, %v3634_v1 }
  0x63   : > { %3201 = vmatpush3.bf16.msra.mxu0 %v3470_v0  ;;  %v1000_v3 = vpack.c.bf16 %v999_v2, %v999_v2  ;;  %v3037_v4 = vld [vmem:[%s4367_s22] ss:$0 sm:$0xff] }
  0x64   : > { %v3040_v21 = vld [vmem:[%s4368_s2] ss:$0 sm:$0xff] }
  0x65   : > { %v3041_v23 = vld [vmem:[%s4369_s11] ss:$0 sm:$0xff] }
  0x66   : > { %3203 = vmatmul.mubr.msk.bf16.vlgmr.msra.gmra.mxu0 %vm1016_vm1, %v1000_v3 }
 0x126   : > { %v1054_v5 = vpop.f32.mrf.mxu0 }
 0x127   : > { %v1055_v6 = vadd.f32 %v3037_v4, %v1054_v5 }
 0x128   : > { %v3204_v7 = vpop.f32.mrf.mxu0 }
 0x129   : > { %v1060_v8 = vmul.f32 5.656854, %v1055_v6 }
 0x12a   : > { %v1057_v9 = vpop.f32.mrf.mxu0 }
 0x12b   : > { %v1064_v10 = vsel %vm1063_vm2, %v1060_v8, 0.0 }
 0x12c   : > { %1065 = vadd.xlane.f32.xlu0 %v1064_v10  ;;  %v3205_v11 = vpop.f32.mrf.mxu0 }
 0x1b5   : > { %v1066_v12 = vpop.xlane.xlu0 %1065 }
 0x1b6   : > { %v1068_v13 = vmul.f32 0.03125, %v1066_v12 }
 0x1b8   : > { %v1069_v14 = vsub.f32 %v1060_v8, %v1068_v13 }
 0x1ba   : > { %v1070_v15 = vmul.f32 %v1069_v14, %v1069_v14 }
 0x1bc   : > { %v1071_v16 = vsel %vm1063_vm2, %v1070_v15, 0.0 }
 0x1bd   : > { %1072 = vadd.xlane.f32.xlu0 %v1071_v16 }
 0x246   : > { %v1073_v17 = vpop.xlane.xlu0 %1072 }
 0x247   : > { %v1074_v18 = vmul.f32 0.03125, %v1073_v17 }
 0x249   : > { %v1075_v19 = vadd.f32 1e-06, %v1074_v18 }
 0x24b   : > { %3471 = vrsqrt.f32 %v1075_v19 }
 0x258   : > { %v3472_v20 = vpop.eup %3471 }
 0x259   : > { %v1077_v22 = vmul.f32 %v3472_v20, %v1069_v14 }
 0x25b   : > { %v1084_v24 = vmul.f32 %v3040_v21, %v1077_v22 }
 0x25d   : > { %v1091_v25 = vadd.f32 %v3041_v23, %v1084_v24 }
 0x25f   : > { %1092 = vst.msk [vmem:[#allocation2] sm:$0xff] %vm1063_vm2, %v1091_v25 }
 0x260 PF: > { %vm1105_vm3 = vcmask 261120   ;;  %v3473_v33 = vld [vmem:[%s3862_s3 + $0x8] sm:$0xff]   ;;  %v3474_v34 = vld [vmem:[%s3862_s3 + $0x18] sm:$0xff]   ;;  %v3636_v35 = vmov 0.0   ;;  %v3475_v36 = vld [vmem:[%s3862_s3] sm:$0xff]   ;;  %vm3637_vm4 = vmmov 0   ;;  %s4379_s9 = scalar_lea.vmem %s4286_s15, %s3845_s27 }
 0x261   : > { %3206 = vmatprep.subr.bf16.mxu0 %v3636_v35  ;;  %3214 = vmatprep.subr.bf16.mxu1 %v3636_v35  ;;  %v3476_v37 = vld [vmem:[%s3862_s3 + $0x10] sm:$0xff]   ;;  %s4370_s12 = sld [smem:[#allocation30_spill]]  ;;  %v3477_v47 = vld [vmem:[%s3862_s3 + $0x28] sm:$0xff]   ;;  %v3478_v48 = vld [vmem:[%s3862_s3 + $0x38] sm:$0xff]   ;;  %vm1902_vm5 = vcmask 64512   ;;  %vm2152_vm6 = vcmask 1043456  }
 0x262   : > { %3207 = vmatpush3.bf16.msra.mxu0 %v3473_v33  ;;  %3215 = vmatpush3.bf16.msra.mxu1 %v3474_v34  ;;  %s4372_s4 = sld [smem:[#allocation31_spill]]  ;;  %v3479_v50 = vld [vmem:[%s3862_s3 + $0x20] sm:$0xff]   ;;  %v3480_v51 = vld [vmem:[%s3862_s3 + $0x30] sm:$0xff]   ;;  %v3481_v52 = vld [vmem:[%s3873_s24 + $0x8] sm:$0xff]   ;;  %vm2679_vm10 = vcmask 523264  }
 0x263   : > { %3208 = vmatprep.subr.bf16.mxu0 %v3636_v35  ;;  %3216 = vmatprep.subr.bf16.mxu1 %v3636_v35  ;;  %v3482_v53 = vld [vmem:[%s3873_s24 + $0x18] sm:$0xff]   ;;  %v3483_v54 = vld [vmem:[%s3873_s24] sm:$0xff]   ;;  %v3484_v55 = vld [vmem:[%s3873_s24 + $0x10] sm:$0xff]   ;;  %s4374_s3 = sld [smem:[#allocation22_spill]] }
 0x264   : > { %3210 = vmatprep.mubr.msk.bf16.mxu0 %vm3637_vm4, %v3636_v35  ;;  %3218 = vmatprep.mubr.msk.bf16.mxu1 %vm3637_vm4, %v3636_v35  ;;  %v3485_v56 = vld [vmem:[%s3873_s24 + $0x28] sm:$0xff]   ;;  %v3486_v57 = vld [vmem:[%s3873_s24 + $0x38] sm:$0xff]   ;;  %v3487_v58 = vld [vmem:[%s3873_s24 + $0x20] sm:$0xff]   ;;  %s4380_s10 = sld [smem:[#allocation39_spill]] }
 0x265   : > { %v3488_v59 = vld [vmem:[%s3873_s24 + $0x30] sm:$0xff]   ;;  %v3489_v60 = vld [vmem:[%s3883_s30 + $0x8] sm:$0xff]   ;;  %v3490_v61 = vld [vmem:[%s3883_s30 + $0x18] sm:$0xff]   ;;  %s4375_s24 = sld [smem:[#allocation13_spill]] }
 0x266   : > { %v3944_v26 = vld [vmem:[#allocation2] sm:$0xff]  ;;  %3209 = vmatpush3.bf16.msra.mxu0 %v3475_v36  ;;  %3217 = vmatpush3.bf16.msra.mxu1 %v3476_v37  ;;  %v3492_v63 = vld [vmem:[%s3883_s30 + $0x10] sm:$0xff]   ;;  %v3493_v0 = vld [vmem:[%s3883_s30 + $0x28] sm:$0xff]  }
 0x267   : > { %v1106_v27 = vsel %vm1105_vm3, %v3944_v26, 0.0  ;;  %3222 = vmatprep.subr.bf16.mxu0 %v3636_v35  ;;  %3230 = vmatprep.subr.bf16.mxu1 %v3636_v35  ;;  %s4371_s18 = scalar_lea.vmem %s4370_s12, %s3845_s27  ;;  %v3491_v62 = vld [vmem:[%s3883_s30] sm:$0xff]   ;;  %v3494_v1 = vld [vmem:[%s3883_s30 + $0x38] sm:$0xff]   ;;  %v3496_v3 = vld [vmem:[%s3883_s30 + $0x30] sm:$0xff]  }
 0x268   : > { %1107 = vadd.xlane.f32.xlu0 %v1106_v27  ;;  %v3042_v42 = vld [vmem:[%s4371_s18] ss:$0 sm:$0xff]  ;;  %s4373_s22 = scalar_lea.vmem %s4372_s4, %s3845_s27  ;;  %v3061_v21 = vld [vmem:[%s3878_s28 + $0x1] ss:$0 sm:$0xff] }
 0x269   : > { %v3043_v44 = vld [vmem:[%s4373_s22] ss:$0 sm:$0xff] }
 0x26a   : > { %v3495_v2 = vld [vmem:[%s3883_s30 + $0x20] sm:$0xff]   ;;  %s4378_s30 = sld [smem:[#allocation23_spill]]  ;;  %s4381_s29 = scalar_lea.vmem %s4380_s10, %s3845_s27 }
 0x26b   : > { %v3060_v20 = vld [vmem:[%s3878_s28] ss:$0 sm:$0xff] }
 0x2f1   : > { %v1108_v28 = vpop.xlane.xlu0 %1107 }
 0x2f2   : > { %v1110_v29 = vmul.f32 0.03125, %v1108_v28 }
 0x2f4   : > { %v1111_v30 = vsub.f32 %v3944_v26, %v1110_v29 }
 0x2f6   : > { %v1112_v31 = vmul.f32 %v1111_v30, %v1111_v30 }
 0x2f8   : > { %v1113_v32 = vsel %vm1105_vm3, %v1112_v31, 0.0  ;;  %v3044_v31 = vld [vmem:[%s4374_s3] ss:$0 sm:$0xff] }
 0x2f9   : > { %1114 = vadd.xlane.f32.xlu0 %v1113_v32  ;;  %v3045_v32 = vld [vmem:[%s4374_s3 + $0x1] ss:$0 sm:$0xff] }
 0x382   : > { %v1115_v38 = vpop.xlane.xlu0 %1114 }
 0x383   : > { %v1116_v39 = vmul.f32 0.03125, %v1115_v38 }
 0x385   : > { %v1117_v40 = vadd.f32 1e-06, %v1116_v39 }
 0x387   : > { %3503 = vrsqrt.f32 %v1117_v40  ;;  %v3062_v40 = vld [vmem:[%s3878_s28 + $0x2] ss:$0 sm:$0xff] }
 0x394   : > { %v3504_v41 = vpop.eup %3503 }
 0x395   : > { %v1119_v43 = vmul.f32 %v3504_v41, %v1111_v30  ;;  %v3063_v41 = vld [vmem:[%s3878_s28 + $0x3] ss:$0 sm:$0xff]  ;;  %s1093_s28 = sld [smem:[#allocation4 + %s4375_s24]] }
 0x397   : > { %v1126_v45 = vmul.f32 %v3042_v42, %v1119_v43 }
 0x399   : > { %v1133_v46 = vadd.f32 %v3043_v44, %v1126_v45 }
 0x39b   : > { %v3976_v49 = vpack.c.bf16 %v1133_v46, %v1133_v46 }
 0x39d   : > { %3211 = vmatmul.mubr.msk.bf16.vlgmr.msra.gmra.mxu0 %vm1105_vm3, %v3976_v49  ;;  %3219 = vmatmul.mubr.msk.bf16.vlgmr.msra.gmra.mxu1 %vm1105_vm3, %v3976_v49 }
 0x39e   : > { %3223 = vmatpush3.bf16.msra.mxu0 %v3477_v47  ;;  %3231 = vmatpush3.bf16.msra.mxu1 %v3478_v48 }
 0x39f   : > { %3224 = vmatprep.subr.bf16.mxu0 %v3636_v35  ;;  %3232 = vmatprep.subr.bf16.mxu1 %v3636_v35 }
 0x3a0   : > { %3226 = vmatprep.mubr.msk.bf16.mxu0 %vm3637_vm4, %v3636_v35  ;;  %3234 = vmatprep.mubr.msk.bf16.mxu1 %vm3637_vm4, %v3636_v35 }
 0x3a2   : > { %3225 = vmatpush3.bf16.msra.mxu0 %v3479_v50  ;;  %3233 = vmatpush3.bf16.msra.mxu1 %v3480_v51 }
 0x3a3   : > { %3238 = vmatprep.subr.bf16.mxu0 %v3636_v35  ;;  %3246 = vmatprep.subr.bf16.mxu1 %v3636_v35 }
 0x3a5   : > { %3227 = vmatmul.mubr.msk.bf16.vlgmr.msra.gmra.mxu0 %vm1105_vm3, %v3976_v49  ;;  %3235 = vmatmul.mubr.msk.bf16.vlgmr.msra.gmra.mxu1 %vm1105_vm3, %v3976_v49 }
 0x3a6   : > { %3239 = vmatpush3.bf16.msra.mxu0 %v3481_v52  ;;  %3247 = vmatpush3.bf16.msra.mxu1 %v3482_v53 }
 0x3a7   : > { %3240 = vmatprep.subr.bf16.mxu0 %v3636_v35  ;;  %3248 = vmatprep.subr.bf16.mxu1 %v3636_v35 }
 0x3a8   : > { %3242 = vmatprep.mubr.msk.bf16.mxu0 %vm3637_vm4, %v3636_v35  ;;  %3250 = vmatprep.mubr.msk.bf16.mxu1 %vm3637_vm4, %v3636_v35 }
 0x3aa   : > { %3241 = vmatpush3.bf16.msra.mxu0 %v3483_v54  ;;  %3249 = vmatpush3.bf16.msra.mxu1 %v3484_v55  ;;  %v3046_v54 = vld [vmem:[%s4374_s3 + $0x2] ss:$0 sm:$0xff]  ;;  %v3047_v55 = vld [vmem:[%s4374_s3 + $0x3] ss:$0 sm:$0xff] }
 0x3ab   : > { %3254 = vmatprep.subr.bf16.mxu0 %v3636_v35  ;;  %3262 = vmatprep.subr.bf16.mxu1 %v3636_v35 }
 0x3ad   : > { %3243 = vmatmul.mubr.msk.bf16.vlgmr.msra.gmra.mxu0 %vm1105_vm3, %v3976_v49  ;;  %3251 = vmatmul.mubr.msk.bf16.vlgmr.msra.gmra.mxu1 %vm1105_vm3, %v3976_v49 }
 0x3ae   : > { %3255 = vmatpush3.bf16.msra.mxu0 %v3485_v56  ;;  %3263 = vmatpush3.bf16.msra.mxu1 %v3486_v57 }
 0x3af   : > { %3256 = vmatprep.subr.bf16.mxu0 %v3636_v35  ;;  %3264 = vmatprep.subr.bf16.mxu1 %v3636_v35 }
 0x3b0   : > { %3258 = vmatprep.mubr.msk.bf16.mxu0 %vm3637_vm4, %v3636_v35  ;;  %3266 = vmatprep.mubr.msk.bf16.mxu1 %vm3637_vm4, %v3636_v35 }
 0x3b2   : > { %3257 = vmatpush3.bf16.msra.mxu0 %v3487_v58  ;;  %3265 = vmatpush3.bf16.msra.mxu1 %v3488_v59 }
 0x3b3   : > { %3270 = vmatprep.subr.bf16.mxu0 %v3636_v35  ;;  %3278 = vmatprep.subr.bf16.mxu1 %v3636_v35 }
 0x3b5   : > { %3259 = vmatmul.mubr.msk.bf16.vlgmr.msra.gmra.mxu0 %vm1105_vm3, %v3976_v49  ;;  %3267 = vmatmul.mubr.msk.bf16.vlgmr.msra.gmra.mxu1 %vm1105_vm3, %v3976_v49 }
 0x3b6   : > { %3271 = vmatpush3.bf16.msra.mxu0 %v3489_v60  ;;  %3279 = vmatpush3.bf16.msra.mxu1 %v3490_v61 }
 0x3b7   : > { %3272 = vmatprep.subr.bf16.mxu0 %v3636_v35  ;;  %3280 = vmatprep.subr.bf16.mxu1 %v3636_v35 }
 0x3b8   : > { %3274 = vmatprep.mubr.msk.bf16.mxu0 %vm3637_vm4, %v3636_v35  ;;  %3282 = vmatprep.mubr.msk.bf16.mxu1 %vm3637_vm4, %v3636_v35 }
 0x3ba   : > { %3273 = vmatpush3.bf16.msra.mxu0 %v3491_v62  ;;  %3281 = vmatpush3.bf16.msra.mxu1 %v3492_v63  ;;  %v3076_v62 = vld [vmem:[%s3888_s25] ss:$0 sm:$0xff]  ;;  %v3077_v63 = vld [vmem:[%s3888_s25 + $0x1] ss:$0 sm:$0xff] }
 0x3bb   : > { %3286 = vmatprep.subr.bf16.mxu0 %v3636_v35  ;;  %3294 = vmatprep.subr.bf16.mxu1 %v3636_v35 }
 0x3bd   : > { %3275 = vmatmul.mubr.msk.bf16.vlgmr.msra.gmra.mxu0 %vm1105_vm3, %v3976_v49  ;;  %3283 = vmatmul.mubr.msk.bf16.vlgmr.msra.gmra.mxu1 %vm1105_vm3, %v3976_v49 }
 0x3be   : > { %3287 = vmatpush3.bf16.msra.mxu0 %v3493_v0  ;;  %3295 = vmatpush3.bf16.msra.mxu1 %v3494_v1 }
 0x3bf   : > { %3288 = vmatprep.subr.bf16.mxu0 %v3636_v35  ;;  %3296 = vmatprep.subr.bf16.mxu1 %v3636_v35 }
 0x3c0   : > { %3290 = vmatprep.mubr.msk.bf16.mxu0 %vm3637_vm4, %v3636_v35  ;;  %3298 = vmatprep.mubr.msk.bf16.mxu1 %vm3637_vm4, %v3636_v35 }
 0x3c2   : > { %3289 = vmatpush3.bf16.msra.mxu0 %v3495_v2  ;;  %3297 = vmatpush3.bf16.msra.mxu1 %v3496_v3 }
 0x3c3   : > { %3302 = vmatprep.subr.bf16.mxu0 %v3636_v35  ;;  %3308 = vmatprep.subr.bf16.mxu1 %v3636_v35 }
 0x3c5   : > { %3291 = vmatmul.mubr.msk.bf16.vlgmr.msra.gmra.mxu0 %vm1105_vm3, %v3976_v49  ;;  %3299 = vmatmul.mubr.msk.bf16.vlgmr.msra.gmra.mxu1 %vm1105_vm3, %v3976_v49 }
 0x3c6   : > { %3304 = vmatprep.mubr.msk.bf16.mxu0 %vm3637_vm4, %v3636_v35  ;;  %3310 = vmatprep.mubr.msk.bf16.mxu1 %vm3637_vm4, %v3636_v35 }
 0x45d   : > { %v1228_v4 = vpop.f32.mrf.mxu0  ;;  %v1280_v5 = vpop.f32.mrf.mxu1 }
 0x45e   : > { %v1229_v42 = vadd.f32 %v3044_v31, %v1228_v4  ;;  %v1281_v43 = vadd.f32 %v3045_v32, %v1280_v5 }
 0x45f   : > { %v3212_v6 = vpop.f32.mrf.mxu0  ;;  %v3220_v7 = vpop.f32.mrf.mxu1 }
 0x460   : > { %v1894_v50 = vpack.c.bf16 %v1229_v42, %v1229_v42  ;;  %v1895_v51 = vpack.c.bf16 %v1281_v43, %v1281_v43 }
 0x461   : > { %v1231_v8 = vpop.f32.mrf.mxu0  ;;  %v1283_v9 = vpop.f32.mrf.mxu1 }
 0x463   : > { %v3213_v10 = vpop.f32.mrf.mxu0  ;;  %v3221_v11 = vpop.f32.mrf.mxu1 }
 0x465   : > { %v1332_v12 = vpop.f32.mrf.mxu0  ;;  %v1384_v13 = vpop.f32.mrf.mxu1 }
 0x466   : > { %v1333_v0 = vadd.f32 %v3046_v54, %v1332_v12  ;;  %v1385_v1 = vadd.f32 %v3047_v55, %v1384_v13 }
 0x467   : > { %v3228_v14 = vpop.f32.mrf.mxu0  ;;  %v3236_v15 = vpop.f32.mrf.mxu1 }
 0x468   : > { %v1896_v8 = vpack.c.bf16 %v1333_v0, %v1333_v0  ;;  %v1897_v9 = vpack.c.bf16 %v1385_v1, %v1385_v1 }
 0x469   : > { %v1335_v16 = vpop.f32.mrf.mxu0  ;;  %v1387_v17 = vpop.f32.mrf.mxu1 }
 0x46b   : > { %v3229_v18 = vpop.f32.mrf.mxu0  ;;  %v3237_v19 = vpop.f32.mrf.mxu1 }
 0x46d   : > { %v1480_v22 = vpop.f32.mrf.mxu0  ;;  %v1532_v23 = vpop.f32.mrf.mxu1 }
 0x46e   : > { %v1481_v24 = vadd.f32 %v3060_v20, %v1480_v22  ;;  %v1533_v25 = vadd.f32 %v3061_v21, %v1532_v23 }
 0x46f   : > { %v3244_v27 = vpop.f32.mrf.mxu0  ;;  %v3252_v28 = vpop.f32.mrf.mxu1 }
 0x470   : > { %v1898_v29 = vpack.c.bf16 %v1481_v24, %v1481_v24  ;;  %v1899_v30 = vpack.c.bf16 %v1533_v25, %v1533_v25  ;;  %v1094_v27 = vlaneseq }
 0x471   : > { %v1483_v33 = vpop.f32.mrf.mxu0  ;;  %v1535_v34 = vpop.f32.mrf.mxu1 }
 0x472   : > { %v1907_v36 = vsel %vm1902_vm5, %v1898_v29, 0  ;;  %v1953_v37 = vsel %vm1902_vm5, %v1899_v30, 0  ;;  %v1095_v28 = vshrl.u32 %v1094_v27, 7  ;;  %v1097_v29 = vand.u32 127, %v1094_v27 }
 0x473   : > { %v3245_v38 = vpop.f32.mrf.mxu0  ;;  %v3253_v39 = vpop.f32.mrf.mxu1  ;;  %3303 = vmatpush3.bf16.xpose.msra.mxu0 %v1907_v36  ;;  %3309 = vmatpush3.bf16.xpose.msra.mxu1 %v1953_v37  ;;  %v1098_v30 = vstv %s1093_s28 }
 0x474   : > { %3314 = vmatprep.subr.bf16.mxu0 %v3636_v35  ;;  %3320 = vmatprep.subr.bf16.mxu1 %v3636_v35  ;;  %vm1099_vm7 = vcmp.ge.s32.totalorder %v1095_v28, %v1098_v30  ;;  %vm1100_vm8 = vcmp.ge.s32.totalorder %v1097_v29, %v1098_v30 }
 0x475   : > { %v1584_v44 = vpop.f32.mrf.mxu0  ;;  %v1636_v45 = vpop.f32.mrf.mxu1  ;;  %vm4103_vm9 = vmand %vm1099_vm7, %vm1100_vm8 }
 0x476   : > { %v1585_v46 = vadd.f32 %v3062_v40, %v1584_v44  ;;  %v1637_v47 = vadd.f32 %v3063_v41, %v1636_v45 }
 0x477   : > { %v3260_v48 = vpop.f32.mrf.mxu0  ;;  %v3268_v49 = vpop.f32.mrf.mxu1 }
 0x478   : > { %v1900_v52 = vpack.c.bf16 %v1585_v46, %v1585_v46  ;;  %v1901_v53 = vpack.c.bf16 %v1637_v47, %v1637_v47 }
 0x479   : > { %v1587_v56 = vpop.f32.mrf.mxu0  ;;  %v1639_v57 = vpop.f32.mrf.mxu1 }
 0x47a   : > { %v1999_v58 = vsel %vm1902_vm5, %v1900_v52, 0  ;;  %v2045_v59 = vsel %vm1902_vm5, %v1901_v53, 0  ;;  %3305 = vmatmul.mubr.msk.bf16.vlgmr.msra.gmra.mxu0 %vm1902_vm5, %v1894_v50  ;;  %3311 = vmatmul.mubr.msk.bf16.vlgmr.msra.gmra.mxu1 %vm1902_vm5, %v1895_v51 }
 0x47b   : > { %v3261_v60 = vpop.f32.mrf.mxu0  ;;  %v3269_v61 = vpop.f32.mrf.mxu1  ;;  %3315 = vmatpush3.bf16.xpose.msra.mxu0 %v1999_v58  ;;  %3321 = vmatpush3.bf16.xpose.msra.mxu1 %v2045_v59 }
 0x47c   : > { %3316 = vmatprep.mubr.msk.bf16.mxu0 %vm3637_vm4, %v3636_v35  ;;  %3322 = vmatprep.mubr.msk.bf16.mxu1 %vm3637_vm4, %v3636_v35 }
 0x47d   : > { %v1732_v2 = vpop.f32.mrf.mxu0  ;;  %v1784_v3 = vpop.f32.mrf.mxu1  ;;  %3326 = vmatprep.subr.bf16.mxu0 %v3636_v35  ;;  %3332 = vmatprep.subr.bf16.mxu1 %v3636_v35 }
 0x47e   : > { %v1733_v4 = vadd.f32 %v3076_v62, %v1732_v2  ;;  %v1785_v5 = vadd.f32 %v3077_v63, %v1784_v3 }
 0x47f   : > { %v3276_v6 = vpop.f32.mrf.mxu0  ;;  %v3284_v7 = vpop.f32.mrf.mxu1 }
 0x480   : > { %v2145_v10 = vpack.c.bf16 %v1733_v4, %v1733_v4  ;;  %v2146_v11 = vpack.c.bf16 %v1785_v5, %v1785_v5 }
 0x481   : > { %v1735_v12 = vpop.f32.mrf.mxu0  ;;  %v1787_v13 = vpop.f32.mrf.mxu1 }
 0x482   : > { %v2154_v14 = vsel %vm2152_vm6, %v2145_v10, 0  ;;  %v2200_v15 = vsel %vm2152_vm6, %v2146_v11, 0  ;;  %3317 = vmatmul.mubr.msk.bf16.vlgmr.msra.gmra.mxu0 %vm1902_vm5, %v1896_v8  ;;  %3323 = vmatmul.mubr.msk.bf16.vlgmr.msra.gmra.mxu1 %vm1902_vm5, %v1897_v9 }
 0x483   : > { %v3277_v16 = vpop.f32.mrf.mxu0  ;;  %v3285_v17 = vpop.f32.mrf.mxu1  ;;  %3327 = vmatpush3.bf16.msra.mxu0 %v2154_v14  ;;  %3333 = vmatpush3.bf16.msra.mxu1 %v2200_v15 }
 0x484   : > { %3328 = vmatprep.mubr.msk.bf16.mxu0 %vm3637_vm4, %v3636_v35  ;;  %3338 = vmatprep.subr.bf16.mxu0 %v3636_v35 }
 0x485   : > { %v4095_v18 = vpop.f32.mrf.mxu0  ;;  %v4097_v19 = vpop.f32.mrf.mxu1  ;;  %3334 = vmatprep.mubr.msk.bf16.mxu1 %vm3637_vm4, %v3636_v35  ;;  %3344 = vmatprep.subr.bf16.mxu1 %v3636_v35 }
 0x487   : > { %v3292_v20 = vpop.f32.mrf.mxu0  ;;  %v3300_v21 = vpop.f32.mrf.mxu1 }
 0x488   : > { %v3078_v21 = vld [vmem:[%s3888_s25 + $0x2] ss:$0 sm:$0xff] }
 0x489   : > { %v1839_v22 = vpop.f32.mrf.mxu0  ;;  %v1891_v23 = vpop.f32.mrf.mxu1 }
 0x48b   : > { %v3293_v24 = vpop.f32.mrf.mxu0  ;;  %v3301_v25 = vpop.f32.mrf.mxu1 }
 0x48c   : > { %v1837_v24 = vadd.f32 %v3078_v21, %v4095_v18  ;;  %v3079_v25 = vld [vmem:[%s3888_s25 + $0x3] ss:$0 sm:$0xff] }
 0x48d   : > { %v1889_v29 = vadd.f32 %v3079_v25, %v4097_v19 }
 0x48e   : > { %v2147_v28 = vpack.c.bf16 %v1837_v24, %v1837_v24 }
 0x490   : > { %v2246_v33 = vsel %vm2152_vm6, %v2147_v28, 0  ;;  %v3104_v28 = vld [vmem:[%s4379_s9] ss:$0 sm:$0xff] }
 0x53a   : > { %v1943_v31 = vpop.f32.mrf.mxu0  ;;  %v1989_v32 = vpop.f32.mrf.mxu1 }
 0x53b   : > { %v2087_v34 = vmul.f32 0.35355338, %v1943_v31  ;;  %v2088_v36 = vmul.f32 0.35355338, %v1989_v32 }
 0x53c   : > { %v3306_v37 = vpop.f32.mrf.mxu0  ;;  %v3312_v38 = vpop.f32.mrf.mxu1 }
 0x53d   : > { %v2093_v39 = vsel %vm4103_vm9, -1024.0, %v2087_v34  ;;  %v2094_v43 = vsel %vm4103_vm9, -1024.0, %v2088_v36  ;;  %v2148_v34 = vpack.c.bf16 %v1889_v29, %v1889_v29  ;;  %v2338_v38 = vld [vmem:[%s4378_s30] sm:$0xf] }
 0x53e   : > { %v1946_v40 = vpop.f32.mrf.mxu0  ;;  %v1992_v41 = vpop.f32.mrf.mxu1  ;;  %v2097_v42 = vsel %vm1902_vm5, %v2093_v39, -inf  ;;  %v2100_v48 = vsel %vm1902_vm5, %v2094_v43, -inf }
 0x53f   : > { %2098 = vmax.xlane.f32.xlu1 %v2097_v42  ;;  %v2292_v19 = vsel %vm2152_vm6, %v2148_v34, 0 }
 0x540   : > { %v3307_v44 = vpop.f32.mrf.mxu0  ;;  %v3313_v45 = vpop.f32.mrf.mxu1 }
 0x541   : > { %v2339_v45 = vld [vmem:[%s4378_s30 + $0x4] sm:$0xf] }
 0x542   : > { %v2035_v46 = vpop.f32.mrf.mxu0  ;;  %v2081_v47 = vpop.f32.mrf.mxu1 }
 0x543   : > { %v2089_v49 = vmul.f32 0.35355338, %v2035_v46  ;;  %v2090_v50 = vmul.f32 0.35355338, %v2081_v47  ;;  %2101 = vmax.xlane.f32.xlu1 %v2100_v48  ;;  %v2392_v46 = vsel %vm2152_vm6, %v2339_v45, 0 }
 0x544   : > { %v3318_v51 = vpop.f32.mrf.mxu0  ;;  %v3324_v52 = vpop.f32.mrf.mxu1  ;;  %v2340_v47 = vld [vmem:[%s4378_s30 + $0x8] sm:$0xf] }
 0x545   : > { %v2095_v53 = vsel %vm4103_vm9, -1024.0, %v2089_v49  ;;  %v2096_v54 = vsel %vm4103_vm9, -1024.0, %v2090_v50  ;;  %v2438_v50 = vsel %vm2152_vm6, %v2340_v47, 0  ;;  %v2341_v52 = vld [vmem:[%s4378_s30 + $0xc] sm:$0xf] }
 0x546   : > { %v2038_v55 = vpop.f32.mrf.mxu0  ;;  %v2084_v56 = vpop.f32.mrf.mxu1  ;;  %v2103_v57 = vsel %vm1902_vm5, %v2095_v53, -inf  ;;  %v2106_v58 = vsel %vm1902_vm5, %v2096_v54, -inf }
 0x547   : > { %2104 = vmax.xlane.f32.xlu0 %v2103_v57  ;;  %2107 = vmax.xlane.f32.xlu1 %v2106_v58  ;;  %v2484_v56 = vsel %vm2152_vm6, %v2341_v52, 0 }
 0x548   : > { %v3319_v59 = vpop.f32.mrf.mxu0  ;;  %v3325_v60 = vpop.f32.mrf.mxu1 }
 0x5c8   : > { %v2099_v61 = vpop.xlane.xlu1 %2098 }
 0x5c9   : > { %v2109_v62 = vsub.f32 %v2093_v39, %v2099_v61 }
 0x5cb   : > { %v2113_v63 = vmul.f32 1.442695, %v2109_v62 }
 0x5cc   : > { %v2102_v0 = vpop.xlane.xlu1 %2101 }
 0x5cd   : > { %3505 = vpow2.f32 %v2113_v63  ;;  %v2110_v1 = vsub.f32 %v2094_v43, %v2102_v0  ;;  %v2346_v43 = vsel %vm2152_vm6, %v2338_v38, 0 }
 0x5cf   : > { %v2115_v2 = vmul.f32 1.442695, %v2110_v1 }
 0x5d0   : > { %v2105_v3 = vpop.xlane.xlu0 %2104  ;;  %v2108_v4 = vpop.xlane.xlu1 %2107 }
 0x5d1   : > { %3507 = vpow2.f32 %v2115_v2  ;;  %v2111_v5 = vsub.f32 %v2095_v53, %v2105_v3  ;;  %v2112_v6 = vsub.f32 %v2096_v54, %v2108_v4 }
 0x5d3   : > { %v2117_v7 = vmul.f32 1.442695, %v2111_v5  ;;  %v2119_v8 = vmul.f32 1.442695, %v2112_v6 }
 0x5d5   : > { %3509 = vpow2.f32 %v2117_v7 }
 0x5d6   : > { %3511 = vpow2.f32 %v2119_v8 }
 0x5da   : > { %v3506_v9 = vpop.eup %3505 }
 0x5db   : > { %v2121_v10 = vsel %vm1902_vm5, %v3506_v9, 0.0 }
 0x5dc   : > { %2122 = vadd.xlane.f32.xlu0 %v2121_v10 }
 0x5de   : > { %v3508_v11 = vpop.eup %3507 }
 0x5df   : > { %v2124_v12 = vsel %vm1902_vm5, %v3508_v11, 0.0 }
 0x5e0   : > { %2125 = vadd.xlane.f32.xlu1 %v2124_v12 }
 0x5e2   : > { %v3510_v13 = vpop.eup %3509 }
 0x5e3   : > { %v3512_v14 = vpop.eup %3511  ;;  %v2127_v15 = vsel %vm1902_vm5, %v3510_v13, 0.0 }
 0x5e4   : > { %2128 = vadd.xlane.f32.xlu0 %v2127_v15  ;;  %v2130_v16 = vsel %vm1902_vm5, %v3512_v14, 0.0 }
 0x5e5   : > { %2131 = vadd.xlane.f32.xlu1 %v2130_v16 }
 0x665   : > { %v2123_v17 = vpop.xlane.xlu0 %2122 }
 0x666   : > { %3513 = vrcp.f32 %v2123_v17 }
 0x669   : > { %v2126_v20 = vpop.xlane.xlu1 %2125 }
 0x66a   : > { %3515 = vrcp.f32 %v2126_v20 }
 0x66d   : > { %v2129_v22 = vpop.xlane.xlu0 %2128 }
 0x66e   : > { %3517 = vrcp.f32 %v2129_v22  ;;  %v2132_v23 = vpop.xlane.xlu1 %2131 }
 0x66f   : > { %3519 = vrcp.f32 %v2132_v23 }
 0x673   : > { %v3514_v27 = vpop.eup %3513 }
 0x674   : > { %v2137_v30 = vmul.f32 %v3514_v27, %v3506_v9 }
 0x676   : > { %v2141_v31 = vpack.c.bf16 %v2137_v30, %v2137_v30 }
 0x677   : > { %v3516_v32 = vpop.eup %3515 }
 0x678   : > { %3329 = vmatmul.mubr.msk.bf16.vlgmr.msra.gmra.mxu0 %vm1902_vm5, %v2141_v31  ;;  %v2138_v36 = vmul.f32 %v3516_v32, %v3508_v11 }
 0x679   : > { %3339 = vmatpush3.bf16.msra.mxu0 %v2246_v33  ;;  %3340 = vmatprep.mubr.msk.bf16.mxu0 %vm3637_vm4, %v3636_v35 }
 0x67a   : > { %v2142_v18 = vpack.c.bf16 %v2138_v36, %v2138_v36  ;;  %3350 = vmatprep.subr.bf16.mxu0 %v3636_v35 }
 0x67b   : > { %v3518_v37 = vpop.eup %3517 }
 0x67c   : > { %v3520_v39 = vpop.eup %3519  ;;  %3335 = vmatmul.mubr.msk.bf16.vlgmr.msra.gmra.mxu1 %vm1902_vm5, %v2142_v18  ;;  %v2139_v40 = vmul.f32 %v3518_v37, %v3510_v13 }
 0x67d   : > { %3345 = vmatpush3.bf16.msra.mxu1 %v2292_v19  ;;  %3346 = vmatprep.mubr.msk.bf16.mxu1 %vm3637_vm4, %v3636_v35  ;;  %v2140_v42 = vmul.f32 %v3520_v39, %v3512_v14 }
 0x67e   : > { %v2143_v41 = vpack.c.bf16 %v2139_v40, %v2139_v40  ;;  %3356 = vmatprep.subr.bf16.mxu1 %v3636_v35 }
 0x67f   : > { %v2144_v44 = vpack.c.bf16 %v2140_v42, %v2140_v42  ;;  %v3498_v42 = vld [vmem:[%s3911_s13] sm:$0xff]  }
 0x680   : > { %3341 = vmatmul.mubr.msk.bf16.vlgmr.msra.gmra.mxu0 %vm1902_vm5, %v2143_v41  ;;  %v3497_v41 = vld [vmem:[%s3911_s13 + $0x8] sm:$0xff]  }
 0x681   : > { %3351 = vmatpush3.bf16.msra.mxu0 %v2346_v43  ;;  %3352 = vmatprep.mubr.msk.bf16.mxu0 %vm3637_vm4, %v3636_v35  ;;  %v3500_v43 = vld [vmem:[%s3925_s16 + $0x10] sm:$0xff]  }
 0x682   : > { %3362 = vmatprep.subr.bf16.mxu0 %v3636_v35 }
 0x684   : > { %3347 = vmatmul.mubr.msk.bf16.vlgmr.msra.gmra.mxu1 %vm1902_vm5, %v2144_v44 }
 0x685   : > { %3358 = vmatprep.mubr.msk.bf16.mxu1 %vm3637_vm4, %v3636_v35  ;;  %3357 = vmatpush3.bf16.msra.mxu1 %v2392_v46 }
 0x686   : > { %3368 = vmatprep.subr.bf16.mxu1 %v3636_v35 }
 0x738   : > { %v2190_v48 = vpop.f32.mrf.mxu0 }
 0x739   : > { %v2334_v49 = vpack.c.bf16 %v2190_v48, %v2190_v48  ;;  %v3105_v48 = vld [vmem:[%s4381_s29] ss:$0 sm:$0xff] }
 0x73a   : > { %v3330_v51 = vpop.f32.mrf.mxu0 }
 0x73b   : > { %3353 = vmatmul.mubr.msk.bf16.vlgmr.msra.gmra.mxu0 %vm1902_vm5, %v2334_v49 }
 0x73c   : > { %v2193_v53 = vpop.f32.mrf.mxu0  ;;  %v2236_v54 = vpop.f32.mrf.mxu1  ;;  %3363 = vmatpush3.bf16.msra.mxu0 %v2438_v50  ;;  %3364 = vmatprep.mubr.msk.bf16.mxu0 %vm3637_vm4, %v3636_v35  ;;  %v3106_v50 = vld [vmem:[%s977_s23] ss:$0 sm:$0xff] }
 0x73d   : > { %v2335_v55 = vpack.c.bf16 %v2236_v54, %v2236_v54  ;;  %3374 = vmatprep.subr.bf16.mxu0 %v3636_v35  ;;  %v3501_v54 = vld [vmem:[%s3925_s16 + $0x8] sm:$0xff]  }
 0x73e   : > { %v3331_v57 = vpop.f32.mrf.mxu0  ;;  %v3336_v58 = vpop.f32.mrf.mxu1 }
 0x73f   : > { %3359 = vmatmul.mubr.msk.bf16.vlgmr.msra.gmra.mxu1 %vm1902_vm5, %v2335_v55  ;;  %v3502_v55 = vld [vmem:[%s3925_s16] sm:$0xff]  }
 0x740   : > { %v2239_v59 = vpop.f32.mrf.mxu1  ;;  %v2282_v60 = vpop.f32.mrf.mxu0  ;;  %3369 = vmatpush3.bf16.msra.mxu1 %v2484_v56  ;;  %3370 = vmatprep.mubr.msk.bf16.mxu1 %vm3637_vm4, %v3636_v35  ;;  %v3107_v56 = vld [vmem:[%s985_s14] ss:$0 sm:$0xff]  ;;  %s4382_s14 = sld [smem:[#allocation12_spill]] }
 0x741   : > { %v2336_v61 = vpack.c.bf16 %v2282_v60, %v2282_v60  ;;  %3382 = vmatprep.subr.bf16.mxu1 %v3636_v35 }
 0x742   : > { %v3337_v62 = vpop.f32.mrf.mxu1  ;;  %v3342_v63 = vpop.f32.mrf.mxu0 }
 0x743   : > { %3365 = vmatmul.mubr.msk.bf16.vlgmr.msra.gmra.mxu0 %vm1902_vm5, %v2336_v61 }
 0x744   : > { %v2285_v0 = vpop.f32.mrf.mxu0  ;;  %v2328_v1 = vpop.f32.mrf.mxu1  ;;  %3378 = vmatprep.mubr.msk.bf16.mxu0 %vm3637_vm4, %v3636_v35  ;;  %3375 = vmatpush3.bf16.msra.mxu0 %v3497_v41 }
 0x745   : > { %v2337_v2 = vpack.c.bf16 %v2328_v1, %v2328_v1  ;;  %3376 = vmatprep.subr.bf16.mxu0 %v3636_v35 }
 0x746   : > { %v3343_v3 = vpop.f32.mrf.mxu0  ;;  %v3348_v4 = vpop.f32.mrf.mxu1  ;;  %p3117_p6 = scmp.ne.s32.totalorder %s4382_s14, 1 }
 0x747   : > { %3371 = vmatmul.mubr.msk.bf16.vlgmr.msra.gmra.mxu1 %vm1902_vm5, %v2337_v2  ;;  %s4384_s4 = sld [smem:[#allocation43_spill]] (!%p3117_p6) }
 0x748   : > { %v2331_v5 = vpop.f32.mrf.mxu1  ;;  %3390 = vmatprep.mubr.msk.bf16.mxu1 %vm3637_vm4, %v3636_v35  ;;  %3377 = vmatpush3.bf16.msra.mxu0 %v3498_v42 }
 0x74a   : > { %v3349_v6 = vpop.f32.mrf.mxu1 }
 0x7fb   : > { %v2382_v7 = vpop.f32.mrf.mxu0 }
 0x7fc   : > { %v2526_v16 = vsel %vm1105_vm3, %v2382_v7, 0.0 }
 0x7fd   : > { %v3354_v8 = vpop.f32.mrf.mxu0 }
 0x7ff   : > { %v2385_v9 = vpop.f32.mrf.mxu0  ;;  %v2428_v10 = vpop.f32.mrf.mxu1 }
 0x800   : > { %v2527_v13 = vsel %vm1105_vm3, %v2428_v10, 0.0 }
 0x801   : > { %v3355_v11 = vpop.f32.mrf.mxu0  ;;  %v3360_v12 = vpop.f32.mrf.mxu1  ;;  %v2528_v20 = vadd.f32 %v2527_v13, %v2526_v16 }
 0x803   : > { %v2431_v14 = vpop.f32.mrf.mxu1  ;;  %v2474_v15 = vpop.f32.mrf.mxu0 }
 0x804   : > { %v2529_v17 = vsel %vm1105_vm3, %v2474_v15, 0.0 }
 0x805   : > { %v3361_v21 = vpop.f32.mrf.mxu1  ;;  %v3366_v22 = vpop.f32.mrf.mxu0  ;;  %v2530_v23 = vadd.f32 %v2529_v17, %v2528_v20 }
 0x807   : > { %v2477_v24 = vpop.f32.mrf.mxu0  ;;  %v2520_v25 = vpop.f32.mrf.mxu1 }
 0x808   : > { %v2531_v27 = vsel %vm1105_vm3, %v2520_v25, 0.0 }
 0x809   : > { %v2532_v29 = vadd.f32 %v2531_v27, %v2530_v23  ;;  %v3367_v30 = vpop.f32.mrf.mxu0  ;;  %v3372_v31 = vpop.f32.mrf.mxu1 }
 0x80b   : > { %v2540_v32 = vadd.f32 %v3104_v28, %v2532_v29  ;;  %v2523_v33 = vpop.f32.mrf.mxu1 }
 0x80d   : > { %v3373_v34 = vpop.f32.mrf.mxu1  ;;  %v2541_v36 = vadd.f32 %v2540_v32, %v3944_v26  ;;  %v3499_v26 = vld [vmem:[%s3925_s16 + $0x18] sm:$0xff]  }
 0x80e   : > { %3383 = vmatpush3.bf16.msra.mxu1 %v3499_v26 }
 0x80f   : > { %v2544_v18 = vsel %vm1105_vm3, %v2541_v36, 0.0  ;;  %3384 = vmatprep.subr.bf16.mxu1 %v3636_v35 }
 0x810   : > { %2545 = vadd.xlane.f32.xlu0 %v2544_v18 }
 0x812   : > { %3385 = vmatpush3.bf16.msra.mxu1 %v3500_v43 }
 0x813   : > { %3386 = vmatprep.subr.bf16.mxu1 %v3636_v35 }
 0x816   : > { %3387 = vmatpush3.bf16.msra.mxu1 %v3501_v54 }
 0x817   : > { %3388 = vmatprep.subr.bf16.mxu1 %v3636_v35  ;;  %v3111_v35 = vld [vmem:[%s993_s26] ss:$0 sm:$0xff]  ;;  %s4383_s26 = sld [smem:[#allocation42_spill]] (!%p3117_p6) }
 0x81a   : > { %3389 = vmatpush3.bf16.msra.mxu1 %v3502_v55 }
 0x899   : > { %v2546_v37 = vpop.xlane.xlu0 %2545 }
 0x89a   : > { %v2547_v38 = vmul.f32 0.03125, %v2546_v37 }
 0x89c   : > { %v2548_v39 = vsub.f32 %v2541_v36, %v2547_v38 }
 0x89e   : > { %v2549_v19 = vmul.f32 %v2548_v39, %v2548_v39 }
 0x8a0   : > { %v2550_v40 = vsel %vm1105_vm3, %v2549_v19, 0.0 }
 0x8a1   : > { %2551 = vadd.xlane.f32.xlu1 %v2550_v40 }
 0x92a   : > { %v2552_v44 = vpop.xlane.xlu1 %2551 }
 0x92b   : > { %v2553_v45 = vmul.f32 0.03125, %v2552_v44 }
 0x92d   : > { %v2554_v46 = vadd.f32 1e-06, %v2553_v45 }
 0x92f   : > { %3521 = vrsqrt.f32 %v2554_v46 }
 0x93c   : > { %v3522_v47 = vpop.eup %3521 }
 0x93d   : > { %v2556_v49 = vmul.f32 %v3522_v47, %v2548_v39 }
 0x93f   : > { %v2563_v51 = vmul.f32 %v3105_v48, %v2556_v49 }
 0x941   : > { %v2570_v52 = vadd.f32 %v3106_v50, %v2563_v51 }
 0x943   : > { %v2571_v53 = vpack.c.bf16 %v2570_v52, %v2570_v52 }
 0x945   : > { %3379 = vmatmul.mubr.msk.bf16.vlgmr.msra.gmra.mxu0 %vm1105_vm3, %v2571_v53 }
 0xa05   : > { %v2632_v57 = vpop.f32.mrf.mxu0 }
 0xa06   : > { %v2633_v58 = vadd.f32 %v3107_v56, %v2632_v57 }
 0xa07   : > { %v3380_v59 = vpop.f32.mrf.mxu0 }
 0xa08   : > { %v2638_v60 = vmax.f32 %v2633_v58, 0.0 }
 0xa09   : > { %v2635_v61 = vpop.f32.mrf.mxu0 }
 0xa0a   : > { %v2639_v62 = vpack.c.bf16 %v2638_v60, %v2638_v60 }
 0xa0b   : > { %v3381_v63 = vpop.f32.mrf.mxu0 }
 0xa0c   : > { %3391 = vmatmul.mubr.msk.bf16.vlgmr.msra.gmra.mxu1 %vm2679_vm10, %v2639_v62 }
 0xacc   : > { %v2717_v0 = vpop.f32.mrf.mxu1 }
 0xacd   : > { %v2718_v1 = vadd.f32 %v3111_v35, %v2717_v0 }
 0xace   : > { %v3392_v2 = vpop.f32.mrf.mxu1  ;;  %2728 = sbr.rel (%p3117_p6) target bundleno = 3080 (0xc08), region = 120 }
 0xacf   : > { %v2723_v3 = vadd.f32 %v2718_v1, %v2541_v36 }
 0xad0   : > { %v2720_v4 = vpop.f32.mrf.mxu1 }
 0xad1   : > { %2724 = vst.msk [vmem:[#allocation2] sm:$0xff] %vm1105_vm3, %v2723_v3 }
 0xad2   : > { %v3393_v5 = vpop.f32.mrf.mxu1 }
 0xad3   : > { %v2731_v6 = vsel %vm1105_vm3, %v2723_v3, 0.0  ;;  %v3118_v16 = vld [vmem:[%s4383_s26] ss:$0 sm:$0xff] }
 0xad4   : > { %2732 = vadd.xlane.f32.xlu0 %v2731_v6  ;;  %v3119_v20 = vld [vmem:[%s4384_s4] ss:$0 sm:$0xff] }
 0xb5d   : > { %v2733_v7 = vpop.xlane.xlu0 %2732 }
 0xb5e   : > { %v2734_v8 = vmul.f32 0.03125, %v2733_v7 }
 0xb60   : > { %v2735_v9 = vsub.f32 %v2723_v3, %v2734_v8 }
 0xb62   : > { %v2736_v10 = vmul.f32 %v2735_v9, %v2735_v9 }
 0xb64   : > { %v2737_v11 = vsel %vm1105_vm3, %v2736_v10, 0.0 }
 0xb65   : > { %2738 = vadd.xlane.f32.xlu0 %v2737_v11 }
 0xbee   : > { %v2739_v12 = vpop.xlane.xlu0 %2738 }
 0xbef   : > { %v2740_v13 = vmul.f32 0.03125, %v2739_v12 }
 0xbf1   : > { %v2741_v14 = vadd.f32 1e-06, %v2740_v13 }
 0xbf3   : > { %3523 = vrsqrt.f32 %v2741_v14 }
 0xc00   : > { %v3524_v15 = vpop.eup %3523 }
 0xc01   : > { %v2743_v17 = vmul.f32 %v3524_v15, %v2735_v9 }
 0xc03   : > { %v2750_v21 = vmul.f32 %v3118_v16, %v2743_v17 }
 0xc05   : > { %v2757_v22 = vadd.f32 %v3119_v20, %v2750_v21 }
 0xc07   : > { %2758 = vst.msk [vmem:[%s926_s7] sm:$0xff] %vm1105_vm3, %v2757_v22 }
 0xc08 PF: > { %s4385_s22 = sld [smem:[#allocation13_spill]]  ;;  %s2773_s13 = sshll.u32 %s926_s7, 4  ;;  %s2774_s13 = int_to_ptr.vmem [resolvable:$true] %s2773_s13 }
 0xc09   : > { %s4386_s3 = sld [smem:[#allocation10_spill]]  ;;  %s3537_s29 = scalar_lea.vmem %s2774_s13, 128 }
 0xc0a   : > { %s4388_s8 = sld [smem:[#allocation44_spill]]  ;;  %p3538_p7 = scmp.ne.s32.totalorder %s2774_s13, %s3537_s29 }
 0xc0b   : > { %s3638_s11 = smov [#allocation5]  }
 0xc0c   : > { %p3539_p9 = pnand %p3538_p7, %p3816_p8  ;;  %s3541_s0 = sshll.u32 %s3638_s11, 4  ;;  %s3542_s0 = int_to_ptr.vmem [resolvable:$false] %s3541_s0 }
 0xc0d   : > { %s3543_s20 = scalar_lea.vmem %s3542_s0, 256  ;;  %p3544_p11 = scmp.lt.s32.totalorder %s2774_s13, %s3542_s0 }
 0xc0e   : > { %s3121_s28 = sshll.u32 %s4385_s22, 7  ;;  %p3540_p10 = pneg %p3539_p9 }
 0xc0f   : > { %s4389_s2 = sand.u32 1, %s4386_s3   ;;  %p3545_p12 = scmp.lt.s32.totalorder %s3543_s20, %s3537_s29 }
 0xc10   : > { %s2771_s9 = scalar_lea.hbm %s4388_s8, %s3121_s28  ;;  %s2760_s10 = scalar_lea.sflag [#allocation6], %s4389_s2 }
 0xc11   : > { %p3546_p13 = por %p3545_p12, %p3544_p11 }
 0xc13   : > { %p3547_p1 = pnand %p3546_p13, %p3540_p10 }
 0xc15   : > { %3550 = shalt.err (!%p3547_p1)
}
 0xc16   : > { %s3551_s12 = scalar_lea.hbm %s2771_s9, 128  ;;  %s3555_s23 = scalar_lea.hbm %s4388_s8, 256 }
 0xc17   : > { %p3552_p2 = scmp.ne.s32.totalorder %s2771_s9, %s3551_s12  ;;  %p3556_p5 = scmp.lt.s32.totalorder %s2771_s9, %s4388_s8 }
 0xc18   : > { %p3557_p6 = scmp.lt.s32.totalorder %s3555_s23, %s3551_s12 }
 0xc19   : > { %p3553_p3 = pnand %p3552_p2, %p3816_p8 }
 0xc1a   : > { %p3558_p7 = por %p3557_p6, %p3556_p5 }
 0xc1b   : > { %p3554_p4 = pneg %p3553_p3 }
 0xc1d   : > { %p3559_p9 = pnand %p3558_p7, %p3554_p4 }
 0xc1f   : > { %3562 = shalt.err (!%p3559_p9)
}
 0xc20   : > { %3394 = dma.vmem_to_hbm [thread:$0]  (%p3816_p8), %s2774_s13, 128, %s2771_s9, %s2760_s10  }
 0xc21 PF: > { %s4390_s16 = sld [smem:[#allocation16_spill]] }
 0xc22   : > { %s4391_s27 = sld [smem:[#allocation9_spill]] }
 0xc27   : > { %p3400_p10 = scmp.ge.s32.totalorder %s4390_s16, 2 }
 0xc28   : > { %s2785_s5 = sand.u32 1, %s4391_s27  }
 0xc29   : > { %p3397_p11 = pnand %p3400_p10, %p3826_p0  ;;  %s2786_s6 = scalar_lea.sflag [#allocation6], %s2785_s5 }
 0xc2b   : > { %p3398_p12 = pneg %p3397_p11 }
 0xc2d   : > { %3598 = dma.done.wait (%p3398_p12), %s2786_s6, 128  }
 0xc2e   : > { %3600 = vsyncadd (%p3398_p12), %s2786_s6, 4294967168  ;;  %s43_s18 = sadd.s32 1, %s4390_s16   ;;  %s4393_s2 = sld [smem:[#allocation10_spill]] }
 0xc2f   : > { %p40_p13 = scmp.ge.s32.totalorder %s43_s18, 6   ;;  %s4394_s29 = sld [smem:[#allocation11_spill]] }
 0xc30   : > { %s4395_s0 = sld [smem:[#allocation21_spill]] }
 0xc31   : > { %s4396_s7 = sld [smem:[#allocation14_spill]]  ;;  %42 = sbr.rel (!%p40_p13) target bundleno = 47 (0x2f), region = 203 }
 0xc32   : > { %s4397_s30 = sld [smem:[#allocation15_spill]] }
 0xc33   : > { %s4398_s3 = sld [smem:[#allocation17_spill]] }
 0xc34   : > { %s4399_s25 = sld [smem:[#allocation19_spill]] }
 0xc36   :  { %2791 = vsyncpa [#allocation6], 1 }
 0xc37   :  { %2793 = vsyncpa [#allocation6 + $0x1], 1 }

</bundles_post_ra>
